<compile_context>
chip_gen: v7x
topology: tpu7x:2x2x1
jax: 0.10.0
libtpu: 0.0.40
codegen_flags: <defaults>
</compile_context>

<pallas_src>
import jax
import jax.numpy as jnp
from jax.experimental import pallas as pl
from jax.experimental.pallas import tpu as pltpu

STATE_SIZE = 2
ACTION_SIZE = 4
HIDDEN = 64
LANES = 128          # lane width; hidden / output padded to this
HPAD = 128           # padded contraction dim for fc2/fc3 (MXU-native 128)

# Row offsets inside the small f32 "vector" parameter slab.
_ROW_W1_0 = 0
_ROW_W1_1 = 1
_ROW_B1 = 2
_ROW_B2 = 3
_ROW_B3 = 4
VEC_ROWS = 8         # padded to one full (8, 128) f32 tile

# Grid-axis semantics candidates, best first.  CORE_PARALLEL is what actually
# splits the batch grid across v7x's two TensorCores; PARALLEL is the safe
# fallback (identical codegen to arbitrary on single-TC chips).  A candidate
# that fails to lower is dropped once and never retried.
_SEMANTICS_CANDIDATES = [(pltpu.CORE_PARALLEL,), (pltpu.PARALLEL,)]


def qnetwork_kernel(x_ref, vec_ref, mat_ref, o_ref):
    """One batch tile: fc1 (VPU) -> relu -> fc2 (MXU) -> relu -> fc3 (MXU),
    then transpose the q tile so the store is a tiny lane-dense (4, tm) block."""
    mm_dtype = mat_ref.dtype                          # bf16 (recommended) or f32

    x = x_ref[...]                                    # (TM, 2) f32
    w1r0 = vec_ref[_ROW_W1_0:_ROW_W1_0 + 1, :]        # (1, 128), lanes 64.. are 0
    w1r1 = vec_ref[_ROW_W1_1:_ROW_W1_1 + 1, :]
    b1 = vec_ref[_ROW_B1:_ROW_B1 + 1, :]
    b2 = vec_ref[_ROW_B2:_ROW_B2 + 1, :]
    b3 = vec_ref[_ROW_B3:_ROW_B3 + 1, :]

    # fc1: K=2 contraction as two VPU broadcast multiply-adds (skip the MXU).
    h1 = jnp.maximum(x[:, 0:1] * w1r0 + x[:, 1:2] * w1r1 + b1, 0.0)  # (TM, 128)

    # fc2 on the MXU (128x128 zero-padded weights), f32 accumulation.
    w2 = mat_ref[0:HPAD, :]                           # (128, 128)
    h2 = jnp.dot(h1.astype(mm_dtype), w2, preferred_element_type=jnp.float32)
    h2 = jnp.maximum(h2 + b2, 0.0)

    # fc3 on the MXU; lanes 4..127 stay exactly zero (weights/bias zero-padded).
    w3 = mat_ref[HPAD:2 * HPAD, :]                    # (128, 128)
    q = jnp.dot(h2.astype(mm_dtype), w3, preferred_element_type=jnp.float32) + b3

    # Transpose on the XLU (separate slot from the MXU pushes) and store only
    # the 4 live rows -> (4, tm) lane-dense block, ~30x less HBM writeback.
    qt = jnp.transpose(q)                             # (128, TM)
    o_ref[...] = qt[:ACTION_SIZE, :].astype(o_ref.dtype)


def init_params(key):
    """PyTorch-style Linear init: U(-1/sqrt(fan_in), 1/sqrt(fan_in))."""
    ks = jax.random.split(key, 6)

    def linear(kw, kb, fan_in, fan_out):
        bound = 1.0 / jnp.sqrt(jnp.float32(fan_in))
        w = jax.random.uniform(kw, (fan_in, fan_out), jnp.float32, -bound, bound)
        b = jax.random.uniform(kb, (fan_out,), jnp.float32, -bound, bound)
        return w, b

    w1, b1 = linear(ks[0], ks[1], STATE_SIZE, HIDDEN)
    w2, b2 = linear(ks[2], ks[3], HIDDEN, HIDDEN)
    w3, b3 = linear(ks[4], ks[5], HIDDEN, ACTION_SIZE)
    return (w1, b1, w2, b2, w3, b3)


def pack_params(params, matmul_dtype=jnp.bfloat16):
    """Pack the 6 Linear tensors into 2 pre-padded operands. Do this ONCE and
    reuse across forward calls (weights stay VMEM-resident per call).
    Use bf16 for the matrix slab on all chips (v5e's MXU is bf16/int-only)."""
    w1, b1, w2, b2, w3, b3 = params

    vec = jnp.zeros((VEC_ROWS, LANES), jnp.float32)
    vec = vec.at[_ROW_W1_0, :HIDDEN].set(w1[0])
    vec = vec.at[_ROW_W1_1, :HIDDEN].set(w1[1])
    vec = vec.at[_ROW_B1, :HIDDEN].set(b1)
    vec = vec.at[_ROW_B2, :HIDDEN].set(b2)
    vec = vec.at[_ROW_B3, :ACTION_SIZE].set(b3)

    # Zero-padding of w3/b3 columns 4..127 guarantees rows 4..127 of the
    # transposed q tile are exactly zero (consumers must preserve this).
    mat = jnp.zeros((2 * HPAD, LANES), matmul_dtype)
    mat = mat.at[:HIDDEN, :HIDDEN].set(w2.astype(matmul_dtype))
    mat = mat.at[HPAD:HPAD + HIDDEN, :ACTION_SIZE].set(w3.astype(matmul_dtype))
    return vec, mat


def qnetwork_forward(x, packed, *, block_m=1024):
    """x: (batch, STATE_SIZE) f32. packed = pack_params(params, dtype).
    Returns (batch, ACTION_SIZE) f32 (same semantics as the PyTorch module)."""
    assert block_m % 128 == 0 and block_m > 0
    vec, mat = packed
    batch = x.shape[0]

    # Row tile: multiple of 128 so the transposed (4, tm) output block stores
    # lane-dense (unmasked vst); capped by the 128-rounded batch.
    tm = min(block_m, pl.cdiv(batch, 128) * 128)
    padded = pl.cdiv(batch, tm) * tm
    n_tiles = padded // tm
    # Nudge the tile count even so CORE_PARALLEL splits work evenly across
    # v7x's two TensorCores (no-op on single-core chips / single-tile grids).
    while n_tiles > 1 and n_tiles % 2 == 1 and tm > 128:
        tm = max(128, (tm // 2) // 128 * 128)
        padded = pl.cdiv(batch, tm) * tm
        n_tiles = padded // tm

    if padded != batch:                               # pad last tile (no OOB reads)
        x = jnp.pad(x, ((0, padded - batch), (0, 0)))
    grid = (n_tiles,)

    # Advisory cost so XLA schedules the custom call sensibly inside a jit.
    flops = padded * (2 * STATE_SIZE * HIDDEN + 2 * HIDDEN * HIDDEN
                      + 2 * HIDDEN * ACTION_SIZE)
    bytes_accessed = (padded * STATE_SIZE * 4
                      + vec.size * vec.dtype.itemsize
                      + mat.size * mat.dtype.itemsize
                      + ACTION_SIZE * padded * 4)
    cost = pl.CostEstimate(flops=int(flops), transcendentals=0,
                           bytes_accessed=int(bytes_accessed))

    def build_call(semantics):
        return pl.pallas_call(
            qnetwork_kernel,
            out_shape=jax.ShapeDtypeStruct((ACTION_SIZE, padded), jnp.float32),
            grid_spec=pltpu.PrefetchScalarGridSpec(
                num_scalar_prefetch=0,
                grid=grid,
                in_specs=[
                    pl.BlockSpec((tm, STATE_SIZE), lambda i: (i, 0)),    # x tile
                    pl.BlockSpec((VEC_ROWS, LANES), lambda i: (0, 0)),   # resident
                    pl.BlockSpec((2 * HPAD, LANES), lambda i: (0, 0)),   # resident
                ],
                out_specs=pl.BlockSpec((ACTION_SIZE, tm), lambda i: (0, i)),
            ),
            compiler_params=pltpu.CompilerParams(dimension_semantics=semantics),
            cost_estimate=cost,
        )

    last_exc = None
    out = None
    for sem in tuple(_SEMANTICS_CANDIDATES):
        try:
            out = build_call(sem)(x, vec, mat)
            break
        except Exception as exc:  # e.g. toolchain rejects CORE_PARALLEL
            last_exc = exc
            if len(_SEMANTICS_CANDIDATES) > 1 and sem in _SEMANTICS_CANDIDATES:
                _SEMANTICS_CANDIDATES.remove(sem)
    if out is None:
        raise last_exc

    # Tiny wrapper pass: (4, padded) -> (batch, 4).  ~16 B/row, vs. the old
    # 512 B/row slab slice this is negligible.
    return jnp.transpose(out[:, :batch])


def reference_forward(x, params):
    """Pure-JAX reference with the PyTorch module's f32 semantics."""
    w1, b1, w2, b2, w3, b3 = params
    h1 = jnp.maximum(x @ w1 + b1, 0.0)
    h2 = jnp.maximum(h1 @ w2 + b2, 0.0)
    return h2 @ w3 + b3


if __name__ == "__main__":
    key = jax.random.PRNGKey(0)
    pkey, xkey = jax.random.split(key)
    params = init_params(pkey)

    # 1) Exact-semantics check: f32 weight slab, tiny batch, single grid step.
    batch = 8
    x = jax.random.normal(xkey, (batch, STATE_SIZE), jnp.float32)
    out = qnetwork_forward(x, pack_params(params, jnp.float32), block_m=128)
    out = jax.block_until_ready(out)
    ref = reference_forward(x, params)
    assert out.shape == (batch, ACTION_SIZE)
    assert jnp.allclose(out, ref, atol=1e-5, rtol=1e-5), "f32 kernel mismatch"

    # 2) Production path: bf16 weight slab (MXU-native on v5e/v6e/v7x),
    #    multi-tile grid, batch not a multiple of the tile.
    batch2 = 300
    x2 = jax.random.normal(jax.random.fold_in(xkey, 1),
                           (batch2, STATE_SIZE), jnp.float32)
    out2 = qnetwork_forward(x2, pack_params(params, jnp.bfloat16), block_m=128)
    out2 = jax.block_until_ready(out2)
    ref2 = reference_forward(x2, params)
    assert out2.shape == (batch2, ACTION_SIZE)
    assert jnp.allclose(out2, ref2, atol=5e-2, rtol=5e-2), "bf16 kernel mismatch"

    # 3) Default (large) tile path: tm is capped to the 128-rounded batch.
    out3 = qnetwork_forward(x2, pack_params(params, jnp.bfloat16))
    out3 = jax.block_until_ready(out3)
    assert out3.shape == (batch2, ACTION_SIZE)
    assert jnp.allclose(out3, ref2, atol=5e-2, rtol=5e-2), "default-tile mismatch"

    print("KERNEL_OK")
</pallas_src>

<mosaic_0001>
module attributes {stable_mosaic.version = 11 : i64} {
  func.func @qnetwork_kernel(%arg0: i32, %arg1: memref<128x2xf32, #tpu.memory_space<vmem>>, %arg2: memref<8x128xf32, #tpu.memory_space<vmem>>, %arg3: memref<256x128xf32, #tpu.memory_space<vmem>>, %arg4: memref<4x128xf32, #tpu.memory_space<vmem>>) attributes {dimension_semantics = [#tpu.dimension_semantics<core_parallel>], iteration_bounds = array<i64: 1>, scalar_prefetch = 0 : i64, scratch_operands = 0 : i64, tpu.core_type = #tpu.core_type<tc>, window_params = [{transform_indices = @transform_0, window_bounds = array<i64: 128, 2>}, {pipeline_mode = #tpu.pipeline_mode<synchronous>, transform_indices = @transform_1, window_bounds = array<i64: 8, 128>}, {pipeline_mode = #tpu.pipeline_mode<synchronous>, transform_indices = @transform_2, window_bounds = array<i64: 256, 128>}, {transform_indices = @transform_3, window_bounds = array<i64: 4, 128>}]} {
    %c0 = arith.constant 0 : index
    %c0_0 = arith.constant 0 : index
    %0 = vector.load %arg1[%c0, %c0_0] : memref<128x2xf32, #tpu.memory_space<vmem>>, vector<128x2xf32>
    %c0_1 = arith.constant 0 : index
    %c0_2 = arith.constant 0 : index
    %1 = vector.load %arg2[%c0_1, %c0_2] : memref<8x128xf32, #tpu.memory_space<vmem>>, vector<1x128xf32>
    %c1 = arith.constant 1 : index
    %c0_3 = arith.constant 0 : index
    %2 = vector.load %arg2[%c1, %c0_3] : memref<8x128xf32, #tpu.memory_space<vmem>>, vector<1x128xf32>
    %c2 = arith.constant 2 : index
    %c0_4 = arith.constant 0 : index
    %3 = vector.load %arg2[%c2, %c0_4] : memref<8x128xf32, #tpu.memory_space<vmem>>, vector<1x128xf32>
    %c3 = arith.constant 3 : index
    %c0_5 = arith.constant 0 : index
    %4 = vector.load %arg2[%c3, %c0_5] : memref<8x128xf32, #tpu.memory_space<vmem>>, vector<1x128xf32>
    %c4 = arith.constant 4 : index
    %c0_6 = arith.constant 0 : index
    %5 = vector.load %arg2[%c4, %c0_6] : memref<8x128xf32, #tpu.memory_space<vmem>>, vector<1x128xf32>
    %6 = vector.extract_strided_slice %0 {offsets = [0, 0], sizes = [128, 1], strides = [1, 1]} : vector<128x2xf32> to vector<128x1xf32>
    %7 = vector.broadcast %6 : vector<128x1xf32> to vector<128x128xf32>
    %8 = vector.broadcast %1 : vector<1x128xf32> to vector<128x128xf32>
    %9 = arith.mulf %7, %8 : vector<128x128xf32>
    %10 = vector.extract_strided_slice %0 {offsets = [0, 1], sizes = [128, 1], strides = [1, 1]} : vector<128x2xf32> to vector<128x1xf32>
    %11 = vector.broadcast %10 : vector<128x1xf32> to vector<128x128xf32>
    %12 = vector.broadcast %2 : vector<1x128xf32> to vector<128x128xf32>
    %13 = arith.mulf %11, %12 : vector<128x128xf32>
    %14 = arith.addf %9, %13 : vector<128x128xf32>
    %15 = vector.broadcast %3 : vector<1x128xf32> to vector<128x128xf32>
    %16 = arith.addf %14, %15 : vector<128x128xf32>
    %cst = arith.constant 0.000000e+00 : f32
    %17 = vector.broadcast %cst : f32 to vector<128x128xf32>
    %18 = arith.maximumf %16, %17 : vector<128x128xf32>
    %c0_7 = arith.constant 0 : index
    %c0_8 = arith.constant 0 : index
    %19 = vector.load %arg3[%c0_7, %c0_8] : memref<256x128xf32, #tpu.memory_space<vmem>>, vector<128x128xf32>
    %cst_9 = arith.constant dense<0.000000e+00> : vector<128x128xf32>
    %20 = tpu.matmul %18, %19, %cst_9 {dimension_numbers = #tpu.dot_dimension_numbers<[1], [0], [0], [1], [0, 0, 1, 1], [], []>} : vector<128x128xf32>, vector<128x128xf32>, vector<128x128xf32> -> vector<128x128xf32>
    %21 = vector.broadcast %4 : vector<1x128xf32> to vector<128x128xf32>
    %22 = arith.addf %20, %21 : vector<128x128xf32>
    %cst_10 = arith.constant 0.000000e+00 : f32
    %23 = vector.broadcast %cst_10 : f32 to vector<128x128xf32>
    %24 = arith.maximumf %22, %23 : vector<128x128xf32>
    %c128 = arith.constant 128 : index
    %c0_11 = arith.constant 0 : index
    %25 = vector.load %arg3[%c128, %c0_11] : memref<256x128xf32, #tpu.memory_space<vmem>>, vector<128x128xf32>
    %cst_12 = arith.constant dense<0.000000e+00> : vector<128x128xf32>
    %26 = tpu.matmul %24, %25, %cst_12 {dimension_numbers = #tpu.dot_dimension_numbers<[1], [0], [0], [1], [0, 0, 1, 1], [], []>} : vector<128x128xf32>, vector<128x128xf32>, vector<128x128xf32> -> vector<128x128xf32>
    %27 = vector.broadcast %5 : vector<1x128xf32> to vector<128x128xf32>
    %28 = arith.addf %26, %27 : vector<128x128xf32>
    %29 = tpu.transpose %28, [1, 0] : vector<128x128xf32> -> vector<128x128xf32>
    %30 = vector.extract_strided_slice %29 {offsets = [0, 0], sizes = [4, 128], strides = [1, 1]} : vector<128x128xf32> to vector<4x128xf32>
    %c0_13 = arith.constant 0 : index
    %c0_14 = arith.constant 0 : index
    %31 = vector.load %arg4[%c0_13, %c0_14] : memref<4x128xf32, #tpu.memory_space<vmem>>, vector<4x128xf32>
    tpu.vector_store %arg4[%c0_13, %c0_14], %30 {strides = array<i32>} : memref<4x128xf32, #tpu.memory_space<vmem>>, vector<4x128xf32>,
    return
  }
  func.func @transform_0(%arg0: i32) -> (i32, i32) {
    %c0_i32 = arith.constant 0 : i32
    %c0_i32_0 = arith.constant 0 : i32
    return %arg0, %c0_i32 : i32, i32
  }
  func.func @transform_1(%arg0: i32) -> (i32, i32) {
    %c0_i32 = arith.constant 0 : i32
    %c0_i32_0 = arith.constant 0 : i32
    %c0_i32_1 = arith.constant 0 : i32
    return %c0_i32, %c0_i32_0 : i32, i32
  }
  func.func @transform_2(%arg0: i32) -> (i32, i32) {
    %c0_i32 = arith.constant 0 : i32
    %c0_i32_0 = arith.constant 0 : i32
    %c0_i32_1 = arith.constant 0 : i32
    return %c0_i32, %c0_i32_0 : i32, i32
  }
  func.func @transform_3(%arg0: i32) -> (i32, i32) {
    %c0_i32 = arith.constant 0 : i32
    %c0_i32_0 = arith.constant 0 : i32
    return %c0_i32, %arg0 : i32, i32
  }
}

module attributes {stable_mosaic.version = 11 : i64} {
  func.func @qnetwork_kernel(%arg0: i32, %arg1: memref<128x2xf32, #tpu.memory_space<vmem>>, %arg2: memref<8x128xf32, #tpu.memory_space<vmem>>, %arg3: memref<256x128xf32, #tpu.memory_space<vmem>>, %arg4: memref<4x128xf32, #tpu.memory_space<vmem>>) attributes {dimension_semantics = [#tpu.dimension_semantics<parallel>], iteration_bounds = array<i64: 1>, scalar_prefetch = 0 : i64, scratch_operands = 0 : i64, tpu.core_type = #tpu.core_type<tc>, window_params = [{transform_indices = @transform_0, window_bounds = array<i64: 128, 2>}, {pipeline_mode = #tpu.pipeline_mode<synchronous>, transform_indices = @transform_1, window_bounds = array<i64: 8, 128>}, {pipeline_mode = #tpu.pipeline_mode<synchronous>, transform_indices = @transform_2, window_bounds = array<i64: 256, 128>}, {transform_indices = @transform_3, window_bounds = array<i64: 4, 128>}]} {
    %c0 = arith.constant 0 : index
    %c0_0 = arith.constant 0 : index
    %0 = vector.load %arg1[%c0, %c0_0] : memref<128x2xf32, #tpu.memory_space<vmem>>, vector<128x2xf32>
    %c0_1 = arith.constant 0 : index
    %c0_2 = arith.constant 0 : index
    %1 = vector.load %arg2[%c0_1, %c0_2] : memref<8x128xf32, #tpu.memory_space<vmem>>, vector<1x128xf32>
    %c1 = arith.constant 1 : index
    %c0_3 = arith.constant 0 : index
    %2 = vector.load %arg2[%c1, %c0_3] : memref<8x128xf32, #tpu.memory_space<vmem>>, vector<1x128xf32>
    %c2 = arith.constant 2 : index
    %c0_4 = arith.constant 0 : index
    %3 = vector.load %arg2[%c2, %c0_4] : memref<8x128xf32, #tpu.memory_space<vmem>>, vector<1x128xf32>
    %c3 = arith.constant 3 : index
    %c0_5 = arith.constant 0 : index
    %4 = vector.load %arg2[%c3, %c0_5] : memref<8x128xf32, #tpu.memory_space<vmem>>, vector<1x128xf32>
    %c4 = arith.constant 4 : index
    %c0_6 = arith.constant 0 : index
    %5 = vector.load %arg2[%c4, %c0_6] : memref<8x128xf32, #tpu.memory_space<vmem>>, vector<1x128xf32>
    %6 = vector.extract_strided_slice %0 {offsets = [0, 0], sizes = [128, 1], strides = [1, 1]} : vector<128x2xf32> to vector<128x1xf32>
    %7 = vector.broadcast %6 : vector<128x1xf32> to vector<128x128xf32>
    %8 = vector.broadcast %1 : vector<1x128xf32> to vector<128x128xf32>
    %9 = arith.mulf %7, %8 : vector<128x128xf32>
    %10 = vector.extract_strided_slice %0 {offsets = [0, 1], sizes = [128, 1], strides = [1, 1]} : vector<128x2xf32> to vector<128x1xf32>
    %11 = vector.broadcast %10 : vector<128x1xf32> to vector<128x128xf32>
    %12 = vector.broadcast %2 : vector<1x128xf32> to vector<128x128xf32>
    %13 = arith.mulf %11, %12 : vector<128x128xf32>
    %14 = arith.addf %9, %13 : vector<128x128xf32>
    %15 = vector.broadcast %3 : vector<1x128xf32> to vector<128x128xf32>
    %16 = arith.addf %14, %15 : vector<128x128xf32>
    %cst = arith.constant 0.000000e+00 : f32
    %17 = vector.broadcast %cst : f32 to vector<128x128xf32>
    %18 = arith.maximumf %16, %17 : vector<128x128xf32>
    %c0_7 = arith.constant 0 : index
    %c0_8 = arith.constant 0 : index
    %19 = vector.load %arg3[%c0_7, %c0_8] : memref<256x128xf32, #tpu.memory_space<vmem>>, vector<128x128xf32>
    %cst_9 = arith.constant dense<0.000000e+00> : vector<128x128xf32>
    %20 = tpu.matmul %18, %19, %cst_9 {dimension_numbers = #tpu.dot_dimension_numbers<[1], [0], [0], [1], [0, 0, 1, 1], [], []>} : vector<128x128xf32>, vector<128x128xf32>, vector<128x128xf32> -> vector<128x128xf32>
    %21 = vector.broadcast %4 : vector<1x128xf32> to vector<128x128xf32>
    %22 = arith.addf %20, %21 : vector<128x128xf32>
    %cst_10 = arith.constant 0.000000e+00 : f32
    %23 = vector.broadcast %cst_10 : f32 to vector<128x128xf32>
    %24 = arith.maximumf %22, %23 : vector<128x128xf32>
    %c128 = arith.constant 128 : index
    %c0_11 = arith.constant 0 : index
    %25 = vector.load %arg3[%c128, %c0_11] : memref<256x128xf32, #tpu.memory_space<vmem>>, vector<128x128xf32>
    %cst_12 = arith.constant dense<0.000000e+00> : vector<128x128xf32>
    %26 = tpu.matmul %24, %25, %cst_12 {dimension_numbers = #tpu.dot_dimension_numbers<[1], [0], [0], [1], [0, 0, 1, 1], [], []>} : vector<128x128xf32>, vector<128x128xf32>, vector<128x128xf32> -> vector<128x128xf32>
    %27 = vector.broadcast %5 : vector<1x128xf32> to vector<128x128xf32>
    %28 = arith.addf %26, %27 : vector<128x128xf32>
    %29 = tpu.transpose %28, [1, 0] : vector<128x128xf32> -> vector<128x128xf32>
    %30 = vector.extract_strided_slice %29 {offsets = [0, 0], sizes = [4, 128], strides = [1, 1]} : vector<128x128xf32> to vector<4x128xf32>
    %c0_13 = arith.constant 0 : index
    %c0_14 = arith.constant 0 : index
    %31 = vector.load %arg4[%c0_13, %c0_14] : memref<4x128xf32, #tpu.memory_space<vmem>>, vector<4x128xf32>
    tpu.vector_store %arg4[%c0_13, %c0_14], %30 {strides = array<i32>} : memref<4x128xf32, #tpu.memory_space<vmem>>, vector<4x128xf32>,
    return
  }
  func.func @transform_0(%arg0: i32) -> (i32, i32) {
    %c0_i32 = arith.constant 0 : i32
    %c0_i32_0 = arith.constant 0 : i32
    return %arg0, %c0_i32 : i32, i32
  }
  func.func @transform_1(%arg0: i32) -> (i32, i32) {
    %c0_i32 = arith.constant 0 : i32
    %c0_i32_0 = arith.constant 0 : i32
    %c0_i32_1 = arith.constant 0 : i32
    return %c0_i32, %c0_i32_0 : i32, i32
  }
  func.func @transform_2(%arg0: i32) -> (i32, i32) {
    %c0_i32 = arith.constant 0 : i32
    %c0_i32_0 = arith.constant 0 : i32
    %c0_i32_1 = arith.constant 0 : i32
    return %c0_i32, %c0_i32_0 : i32, i32
  }
  func.func @transform_3(%arg0: i32) -> (i32, i32) {
    %c0_i32 = arith.constant 0 : i32
    %c0_i32_0 = arith.constant 0 : i32
    return %c0_i32, %arg0 : i32, i32
  }
}

</mosaic_0001>

<bundles_post_ra>
// kernel: tpu_custom_call.1
= control target key start
LH: loop header
LB: loop body
LE: loop exit
PB: predicated region body
PF: predicated region fallthrough
CT: control target
= control target key end

     0   :  { %s1042_s12 = sld [smem:[#allocation0]]   ;;  %s1157_s0 = inlined_call_operand.vmem [shape: f32[128,2], index: 0, kind: input, shape index: {}]   ;;  %s1158_s1 = inlined_call_operand.vmem [shape: f32[8,128], index: 1, kind: input, shape index: {}]   ;;  %s1159_s2 = inlined_call_operand.hbm [shape: f32[256,128], index: 2, kind: input, shape index: {}]   ;;  %s1160_s3 = inlined_call_operand.hbm [shape: f32[4,128], index: 3, kind: output, shape index: {}]  }
   0x1   :  { %8 = vsyncpa [#allocation3], 0 }
   0x2   :  { %9 = vsyncpa [#allocation4], 0  ;;  %s1016_s13 = smov [#allocation2]   ;;  %s966_s17 = scalar_lea.hbm %s1159_s2, 4096 }
   0x3   :  { %s25_s14 = sshll.u32 %s1016_s13, 4  ;;  %p967_p0 = scmp.ne.s32.totalorder %s1159_s2, %s966_s17  ;;  %s26_s14 = int_to_ptr.vmem [resolvable:$true] %s25_s14 }
   0x4   :  { %p970_p1 = scmp.lt.u32.totalorder %s966_s17, %s1159_s2 }
   0x6   :  { %p972_p2 = pnand %p970_p1, %p967_p0 }
   0x8   :  { %975 = shalt.err (!%p972_p2)
}
   0x9   :  { %s976_s22 = scalar_lea.vmem %s26_s14, 4096  ;;  %p981_p4 = scmp.lt.s32.totalorder %s26_s14, %s26_s14 }
   0xa   :  { %p977_p3 = scmp.ne.s32.totalorder %s26_s14, %s976_s22  ;;  %p982_p5 = scmp.lt.s32.totalorder %s976_s22, %s976_s22 }
   0xc   :  { %p983_p6 = por %p982_p5, %p981_p4 }
   0xe   :  { %p984_p7 = pnand %p983_p6, %p977_p3 }
  0x10   :  { %987 = shalt.err (!%p984_p7)
}
  0x11   :  { %s1017_s23 = smov 128   ;;  %s1018_s24 = smov 8  }
  0x12   :  { %31 = dma.hbm_to_vmem [thread:$0]  %s1159_s2, 4096, %s26_s14, [#allocation3], %s1017_s23, %s1017_s23, %s1018_s24  }
  0x13   :  { %1012 = dma.done.wait [#allocation3], 4096  }
  0x14   :  { %1013 = vsyncadd [#allocation3], 4294963200  ;;  %s707_s27 = sshll.u32 %s1042_s12, 4  ;;  %v1019_v0 = vmov 0   ;;  %v1020_v3 = vmov 1   ;;  %v303_v4 = vld [vmem:[#allocation2] sm:$0xff] }
  0x15   :  { %963 = vset.pattern.permute.xlu1 %v1019_v0  ;;  %961 = vset.pattern.permute.xlu0 %v1019_v0  ;;  %p41_p8 = scmp.lt.s32.totalorder %s707_s27, 15  ;;  %v304_v5 = vld [vmem:[#allocation2 + $0x8] sm:$0xff]  ;;  %v305_v7 = vld [vmem:[#allocation2 + $0x10] sm:$0xff]  ;;  %v306_v8 = vld [vmem:[#allocation2 + $0x18] sm:$0xff]  ;;  %s1021_s14 = smov [#allocation5]  }
  0x16   :  { %v891_v6 = vpack.c.bf16 %v304_v5, %v303_v4  ;;  %v895_v10 = vpack.c.bf16 %v306_v8, %v305_v7  ;;  %v307_v11 = vld [vmem:[#allocation2 + $0x20] sm:$0xff]  ;;  %v308_v12 = vld [vmem:[#allocation2 + $0x28] sm:$0xff]  ;;  %v309_v15 = vld [vmem:[#allocation2 + $0x30] sm:$0xff]  ;;  %s690_s15 = sshll.u32 %s1021_s14, 4  ;;  %s691_s15 = int_to_ptr.vmem [resolvable:$true] %s690_s15 }
  0x17   :  { %s1162_s27 = smov (!%p41_p8, %s707_s27), 15  ;;  %v899_v13 = vpack.c.bf16 %v308_v12, %v307_v11  ;;  %v310_v16 = vld [vmem:[#allocation2 + $0x38] sm:$0xff]  ;;  %v311_v19 = vld [vmem:[#allocation2 + $0x40] sm:$0xff]  ;;  %v312_v20 = vld [vmem:[#allocation2 + $0x48] sm:$0xff]  ;;  %s988_s19 = scalar_lea.vmem %s691_s15, 64 }
  0x18   :  { %s708_s28 = sshll.u32 %s1162_s27, 3  ;;  %892 = vmatprep.subr.bf16.mxu0 %v891_v6  ;;  %v903_v17 = vpack.c.bf16 %v310_v16, %v309_v15  ;;  %v907_v21 = vpack.c.bf16 %v312_v20, %v311_v19  ;;  %v313_v23 = vld [vmem:[#allocation2 + $0x50] sm:$0xff]  ;;  %v314_v24 = vld [vmem:[#allocation2 + $0x58] sm:$0xff]  ;;  %v315_v27 = vld [vmem:[#allocation2 + $0x60] sm:$0xff]  ;;  %p989_p9 = scmp.ne.s32.totalorder %s691_s15, %s988_s19 }
  0x19   :  { %s1060_s4 = scalar_lea.vmem %s1157_s0, %s708_s28  ;;  %894 = vmatpush3.bf16.msra.mxu0 %v891_v6  ;;  %v911_v25 = vpack.c.bf16 %v314_v24, %v313_v23  ;;  %v316_v28 = vld [vmem:[#allocation2 + $0x68] sm:$0xff]  ;;  %v317_v31 = vld [vmem:[#allocation2 + $0x70] sm:$0xff]  ;;  %v318_v32 = vld [vmem:[#allocation2 + $0x78] sm:$0xff]  ;;  %p993_p10 = scmp.lt.s32.totalorder %s691_s15, %s691_s15 }
  0x1a   :  { %v47_v1 = vld [vmem:[%s1060_s4 + $0x8] sm:$0xff]  ;;  %v46_v2 = vld [vmem:[%s1060_s4] sm:$0xff]  ;;  %v48_v9 = vld [vmem:[%s1060_s4 + $0x10] sm:$0xff]  ;;  %896 = vmatprep.subr.bf16.mxu0 %v895_v10  ;;  %v915_v29 = vpack.c.bf16 %v316_v28, %v315_v27  ;;  %v919_v33 = vpack.c.bf16 %v318_v32, %v317_v31  ;;  %p994_p11 = scmp.lt.s32.totalorder %s988_s19, %s988_s19 }
  0x1b   :  { %74 = vperm.xlu1 %963, %v47_v1   ;;  %69 = vperm.xlu0 %961, %v46_v2   ;;  %v49_v14 = vld [vmem:[%s1060_s4 + $0x18] sm:$0xff]  ;;  %v50_v18 = vld [vmem:[%s1060_s4 + $0x20] sm:$0xff]  ;;  %v51_v22 = vld [vmem:[%s1060_s4 + $0x28] sm:$0xff] }
  0x1c   :  { %v52_v26 = vld [vmem:[%s1060_s4 + $0x30] sm:$0xff]  ;;  %v53_v30 = vld [vmem:[%s1060_s4 + $0x38] sm:$0xff]  ;;  %v54_v34 = vld [vmem:[%s1060_s4 + $0x40] sm:$0xff]  ;;  %p995_p12 = por %p994_p11, %p993_p10 }
  0x1d   :  { %898 = vmatpush3.bf16.msra.mxu0 %v895_v10  ;;  %v55_v35 = vld [vmem:[%s1060_s4 + $0x48] sm:$0xff]  ;;  %v56_v36 = vld [vmem:[%s1060_s4 + $0x50] sm:$0xff]  ;;  %v57_v37 = vld [vmem:[%s1060_s4 + $0x58] sm:$0xff] }
  0x1e   :  { %900 = vmatprep.subr.bf16.mxu0 %v899_v13  ;;  %v58_v38 = vld [vmem:[%s1060_s4 + $0x60] sm:$0xff]  ;;  %v59_v39 = vld [vmem:[%s1060_s4 + $0x68] sm:$0xff]  ;;  %v60_v40 = vld [vmem:[%s1060_s4 + $0x70] sm:$0xff]  ;;  %p996_p13 = pnand %p995_p12, %p989_p9 }
  0x1f   :  { %964 = vset.pattern.permute.xlu1 %v1020_v3  ;;  %962 = vset.pattern.permute.xlu0 %v1020_v3  ;;  %v61_v41 = vld [vmem:[%s1060_s4 + $0x78] sm:$0xff]  ;;  %v484_v42 = vld [vmem:[#allocation2 + $0x80] sm:$0xff]  ;;  %v485_v43 = vld [vmem:[#allocation2 + $0x88] sm:$0xff] }
  0x20   :  { %172 = vperm.xlu1 %964, %v47_v1   ;;  %168 = vperm.xlu0 %962, %v46_v2   ;;  %v486_v44 = vld [vmem:[#allocation2 + $0x90] sm:$0xff]  ;;  %v923_v45 = vpack.c.bf16 %v485_v43, %v484_v42  ;;  %v487_v46 = vld [vmem:[#allocation2 + $0x98] sm:$0xff]  ;;  %v488_v48 = vld [vmem:[#allocation2 + $0xa0] sm:$0xff] }
  0x21   :  { %902 = vmatpush3.bf16.msra.mxu0 %v899_v13  ;;  %v927_v47 = vpack.c.bf16 %v487_v46, %v486_v44  ;;  %v489_v49 = vld [vmem:[#allocation2 + $0xa8] sm:$0xff]  ;;  %v490_v51 = vld [vmem:[#allocation2 + $0xb0] sm:$0xff]  ;;  %v491_v52 = vld [vmem:[#allocation2 + $0xb8] sm:$0xff] }
  0x22   :  { %904 = vmatprep.subr.bf16.mxu0 %v903_v17  ;;  %924 = vmatprep.subr.bf16.mxu1 %v923_v45  ;;  %v931_v50 = vpack.c.bf16 %v489_v49, %v488_v48  ;;  %v935_v53 = vpack.c.bf16 %v491_v52, %v490_v51  ;;  %v492_v54 = vld [vmem:[#allocation2 + $0xc0] sm:$0xff]  ;;  %v493_v55 = vld [vmem:[#allocation2 + $0xc8] sm:$0xff]  ;;  %v494_v57 = vld [vmem:[#allocation2 + $0xd0] sm:$0xff] }
  0x23   :  { %926 = vmatpush3.bf16.msra.mxu1 %v923_v45  ;;  %v939_v56 = vpack.c.bf16 %v493_v55, %v492_v54  ;;  %v495_v58 = vld [vmem:[#allocation2 + $0xd8] sm:$0xff]  ;;  %v496_v60 = vld [vmem:[#allocation2 + $0xe0] sm:$0xff]  ;;  %v497_v61 = vld [vmem:[#allocation2 + $0xe8] sm:$0xff] }
  0x24   :  { %965 = vset.pattern.permute.xlu1 %v1019_v0  ;;  %176 = vperm.xlu0 %962, %v48_v9   ;;  %v943_v59 = vpack.c.bf16 %v495_v58, %v494_v57  ;;  %v947_v62 = vpack.c.bf16 %v497_v61, %v496_v60  ;;  %v1081_v1 = vld [vmem:[%s1158_s1] ss:$0 sm:$0xff]  ;;  %v1086_v2 = vld [vmem:[%s1158_s1 + $0x1] ss:$0 sm:$0xff] }
  0x25   :  { %79 = vperm.xlu1 %965, %v48_v9   ;;  %906 = vmatpush3.bf16.msra.mxu0 %v903_v17  ;;  %v1095_v9 = vld [vmem:[%s1158_s1 + $0x2] ss:$0 sm:$0xff] }
  0x26   :  { %908 = vmatprep.subr.bf16.mxu0 %v907_v21  ;;  %928 = vmatprep.subr.bf16.mxu1 %v927_v47 }
  0x27   :  { %930 = vmatpush3.bf16.msra.mxu1 %v927_v47 }
  0x28   :  { %180 = vperm.xlu0 %962, %v49_v14   ;;  %932 = vmatprep.subr.bf16.mxu1 %v931_v50 }
  0x29   :  { %84 = vperm.xlu1 %965, %v49_v14   ;;  %910 = vmatpush3.bf16.msra.mxu0 %v907_v21 }
  0x2a   :  { %912 = vmatprep.subr.bf16.mxu0 %v911_v25 }
  0x2b   :  { %934 = vmatpush3.bf16.msra.mxu1 %v931_v50 }
  0x2c   :  { %184 = vperm.xlu0 %962, %v50_v18   ;;  %936 = vmatprep.subr.bf16.mxu1 %v935_v53 }
  0x2d   :  { %89 = vperm.xlu1 %965, %v50_v18   ;;  %914 = vmatpush3.bf16.msra.mxu0 %v911_v25 }
  0x2e   :  { %916 = vmatprep.subr.bf16.mxu0 %v915_v29 }
  0x2f   :  { %938 = vmatpush3.bf16.msra.mxu1 %v935_v53 }
  0x30   :  { %188 = vperm.xlu0 %962, %v51_v22   ;;  %940 = vmatprep.subr.bf16.mxu1 %v939_v56 }
  0x31   :  { %94 = vperm.xlu1 %965, %v51_v22   ;;  %918 = vmatpush3.bf16.msra.mxu0 %v915_v29 }
  0x32   :  { %920 = vmatprep.subr.bf16.mxu0 %v919_v33 }
  0x33   :  { %942 = vmatpush3.bf16.msra.mxu1 %v939_v56 }
  0x34   :  { %192 = vperm.xlu0 %962, %v52_v26   ;;  %944 = vmatprep.subr.bf16.mxu1 %v943_v59 }
  0x35   :  { %99 = vperm.xlu1 %965, %v52_v26   ;;  %922 = vmatpush3.bf16.msra.mxu0 %v919_v33 }
  0x37   :  { %946 = vmatpush3.bf16.msra.mxu1 %v943_v59 }
  0x38   :  { %196 = vperm.xlu0 %962, %v53_v30   ;;  %948 = vmatprep.subr.bf16.mxu1 %v947_v62 }
  0x39   :  { %104 = vperm.xlu1 %965, %v53_v30  }
  0x3b   :  { %950 = vmatpush3.bf16.msra.mxu1 %v947_v62 }
  0x3c   :  { %200 = vperm.xlu0 %962, %v54_v34  }
  0x3d   :  { %109 = vperm.xlu1 %965, %v54_v34  }
  0x40   :  { %204 = vperm.xlu0 %962, %v55_v35  }
  0x41   :  { %114 = vperm.xlu1 %965, %v55_v35  }
  0x44   :  { %208 = vperm.xlu0 %962, %v56_v36  }
  0x45   :  { %119 = vperm.xlu1 %965, %v56_v36  }
  0x48   :  { %212 = vperm.xlu0 %962, %v57_v37  }
  0x49   :  { %124 = vperm.xlu1 %965, %v57_v37  }
  0x4c   :  { %216 = vperm.xlu0 %962, %v58_v38  }
  0x4d   :  { %129 = vperm.xlu1 %965, %v58_v38  }
  0x50   :  { %220 = vperm.xlu0 %962, %v59_v39  }
  0x51   :  { %134 = vperm.xlu1 %965, %v59_v39  }
  0x54   :  { %224 = vperm.xlu0 %962, %v60_v40  }
  0x55   :  { %139 = vperm.xlu1 %965, %v60_v40  }
  0x58   :  { %228 = vperm.xlu0 %962, %v61_v41  }
  0x59   :  { %144 = vperm.xlu1 %965, %v61_v41  }
  0x9a   :  { %v75_v63 = vpop.permute.xlu1 %74  ;;  %v70_v0 = vpop.permute.xlu0 %69 }
  0x9b   :  { %v152_v5 = vmul.f32 %v1081_v1, %v75_v63  ;;  %v151_v6 = vmul.f32 %v1081_v1, %v70_v0 }
  0x9f   :  { %v173_v3 = vpop.permute.xlu1 %172  ;;  %v169_v4 = vpop.permute.xlu0 %168 }
  0xa0   :  { %v236_v7 = vmul.f32 %v1086_v2, %v173_v3  ;;  %v235_v8 = vmul.f32 %v1086_v2, %v169_v4 }
  0xa2   :  { %v252_v10 = vadd.f32 %v236_v7, %v152_v5  ;;  %v251_v11 = vadd.f32 %v235_v8, %v151_v6 }
  0xa3   :  { %v177_v12 = vpop.permute.xlu0 %176 }
  0xa4   :  { %v237_v13 = vmul.f32 %v1086_v2, %v177_v12  ;;  %v80_v14 = vpop.permute.xlu1 %79  ;;  %v271_v15 = vadd.f32 %v1095_v9, %v251_v11  ;;  %v272_v16 = vadd.f32 %v1095_v9, %v252_v10 }
  0xa5   :  { %v153_v17 = vmul.f32 %v1081_v1, %v80_v14 }
  0xa6   :  { %v287_v18 = vmax.f32 %v271_v15, 0.0  ;;  %v288_v19 = vmax.f32 %v272_v16, 0.0 }
  0xa7   :  { %v253_v20 = vadd.f32 %v237_v13, %v153_v17  ;;  %v181_v21 = vpop.permute.xlu0 %180 }
  0xa8   :  { %v238_v22 = vmul.f32 %v1086_v2, %v181_v21  ;;  %v85_v23 = vpop.permute.xlu1 %84  ;;  %811 = vmatprep.mubr.f32.mxu0 %v287_v18 }
  0xa9   :  { %v154_v24 = vmul.f32 %v1081_v1, %v85_v23  ;;  %812 = vmatmul.mubr.f32.vlgmr.msra.gmra.mrb[0].mxu0 %v288_v19  ;;  %v273_v25 = vadd.f32 %v1095_v9, %v253_v20 }
  0xab   :  { %v254_v26 = vadd.f32 %v238_v22, %v154_v24  ;;  %v185_v27 = vpop.permute.xlu0 %184  ;;  %v289_v28 = vmax.f32 %v273_v25, 0.0 }
  0xac   :  { %v239_v29 = vmul.f32 %v1086_v2, %v185_v27  ;;  %v90_v30 = vpop.permute.xlu1 %89 }
  0xad   :  { %v155_v31 = vmul.f32 %v1081_v1, %v90_v30  ;;  %814 = vmatprep.mubr.f32.mxu0 %v289_v28  ;;  %v274_v32 = vadd.f32 %v1095_v9, %v254_v26 }
  0xaf   :  { %v255_v33 = vadd.f32 %v239_v29, %v155_v31  ;;  %v189_v34 = vpop.permute.xlu0 %188  ;;  %v290_v35 = vmax.f32 %v274_v32, 0.0 }
  0xb0   :  { %v240_v36 = vmul.f32 %v1086_v2, %v189_v34  ;;  %v95_v37 = vpop.permute.xlu1 %94 }
  0xb1   :  { %v156_v38 = vmul.f32 %v1081_v1, %v95_v37  ;;  %815 = vmatmul.mubr.f32.gmra.mrb[2].mxu0 %v290_v35  ;;  %v275_v39 = vadd.f32 %v1095_v9, %v255_v33 }
  0xb3   :  { %v256_v40 = vadd.f32 %v240_v36, %v156_v38  ;;  %v193_v41 = vpop.permute.xlu0 %192  ;;  %v291_v42 = vmax.f32 %v275_v39, 0.0 }
  0xb4   :  { %v241_v43 = vmul.f32 %v1086_v2, %v193_v41  ;;  %v100_v44 = vpop.permute.xlu1 %99 }
  0xb5   :  { %v157_v45 = vmul.f32 %v1081_v1, %v100_v44  ;;  %817 = vmatprep.mubr.f32.mxu0 %v291_v42  ;;  %v276_v46 = vadd.f32 %v1095_v9, %v256_v40 }
  0xb7   :  { %v257_v47 = vadd.f32 %v241_v43, %v157_v45  ;;  %v197_v48 = vpop.permute.xlu0 %196  ;;  %v292_v49 = vmax.f32 %v276_v46, 0.0 }
  0xb8   :  { %v242_v50 = vmul.f32 %v1086_v2, %v197_v48  ;;  %v105_v51 = vpop.permute.xlu1 %104 }
  0xb9   :  { %v158_v52 = vmul.f32 %v1081_v1, %v105_v51  ;;  %818 = vmatmul.mubr.f32.gmra.mrb[4].mxu0 %v292_v49  ;;  %v277_v53 = vadd.f32 %v1095_v9, %v257_v47 }
  0xbb   :  { %v258_v54 = vadd.f32 %v242_v50, %v158_v52  ;;  %v201_v55 = vpop.permute.xlu0 %200  ;;  %v293_v56 = vmax.f32 %v277_v53, 0.0  ;;  %v498_v53 = vld [vmem:[#allocation2 + $0xf0] sm:$0xff] }
  0xbc   :  { %v243_v57 = vmul.f32 %v1086_v2, %v201_v55  ;;  %v110_v58 = vpop.permute.xlu1 %109 }
  0xbd   :  { %v159_v59 = vmul.f32 %v1081_v1, %v110_v58  ;;  %820 = vmatprep.mubr.f32.mxu0 %v293_v56  ;;  %v278_v60 = vadd.f32 %v1095_v9, %v258_v54  ;;  %v499_v54 = vld [vmem:[#allocation2 + $0xf8] sm:$0xff] }
  0xbe   :  { %v951_v55 = vpack.c.bf16 %v499_v54, %v498_v53 }
  0xbf   :  { %v259_v61 = vadd.f32 %v243_v57, %v159_v59  ;;  %v205_v62 = vpop.permute.xlu0 %204  ;;  %v294_v63 = vmax.f32 %v278_v60, 0.0 }
  0xc0   :  { %v244_v0 = vmul.f32 %v1086_v2, %v205_v62  ;;  %v115_v3 = vpop.permute.xlu1 %114  ;;  %952 = vmatprep.subr.bf16.mxu1 %v951_v55 }
  0xc1   :  { %v160_v4 = vmul.f32 %v1081_v1, %v115_v3  ;;  %821 = vmatmul.mubr.f32.gmra.mrb[6].mxu0 %v294_v63  ;;  %v279_v5 = vadd.f32 %v1095_v9, %v259_v61  ;;  %954 = vmatpush3.bf16.msra.mxu1 %v951_v55 }
  0xc3   :  { %v260_v6 = vadd.f32 %v244_v0, %v160_v4  ;;  %v209_v7 = vpop.permute.xlu0 %208  ;;  %v295_v8 = vmax.f32 %v279_v5, 0.0 }
  0xc4   :  { %v245_v10 = vmul.f32 %v1086_v2, %v209_v7  ;;  %v120_v11 = vpop.permute.xlu1 %119 }
  0xc5   :  { %v161_v12 = vmul.f32 %v1081_v1, %v120_v11  ;;  %823 = vmatprep.mubr.f32.mxu0 %v295_v8  ;;  %v280_v13 = vadd.f32 %v1095_v9, %v260_v6 }
  0xc7   :  { %v261_v14 = vadd.f32 %v245_v10, %v161_v12  ;;  %v213_v15 = vpop.permute.xlu0 %212  ;;  %v296_v16 = vmax.f32 %v280_v13, 0.0 }
  0xc8   :  { %v246_v17 = vmul.f32 %v1086_v2, %v213_v15  ;;  %v125_v18 = vpop.permute.xlu1 %124 }
  0xc9   :  { %v162_v19 = vmul.f32 %v1081_v1, %v125_v18  ;;  %824 = vmatmul.mubr.f32.gmra.mrb[8].mxu0 %v296_v16  ;;  %v281_v20 = vadd.f32 %v1095_v9, %v261_v14 }
  0xcb   :  { %v262_v21 = vadd.f32 %v246_v17, %v162_v19  ;;  %v217_v22 = vpop.permute.xlu0 %216  ;;  %v297_v23 = vmax.f32 %v281_v20, 0.0 }
  0xcc   :  { %v247_v24 = vmul.f32 %v1086_v2, %v217_v22  ;;  %v130_v25 = vpop.permute.xlu1 %129 }
  0xcd   :  { %v163_v26 = vmul.f32 %v1081_v1, %v130_v25  ;;  %826 = vmatprep.mubr.f32.mxu0 %v297_v23  ;;  %v282_v27 = vadd.f32 %v1095_v9, %v262_v21 }
  0xcf   :  { %v263_v28 = vadd.f32 %v247_v24, %v163_v26  ;;  %v221_v29 = vpop.permute.xlu0 %220  ;;  %v298_v30 = vmax.f32 %v282_v27, 0.0 }
  0xd0   :  { %v248_v31 = vmul.f32 %v1086_v2, %v221_v29  ;;  %v135_v32 = vpop.permute.xlu1 %134 }
  0xd1   :  { %v164_v33 = vmul.f32 %v1081_v1, %v135_v32  ;;  %827 = vmatmul.mubr.f32.gmra.mrb[10].mxu0 %v298_v30  ;;  %v283_v34 = vadd.f32 %v1095_v9, %v263_v28 }
  0xd3   :  { %v264_v35 = vadd.f32 %v248_v31, %v164_v33  ;;  %v225_v36 = vpop.permute.xlu0 %224  ;;  %v299_v37 = vmax.f32 %v283_v34, 0.0 }
  0xd4   :  { %v249_v38 = vmul.f32 %v1086_v2, %v225_v36  ;;  %v140_v39 = vpop.permute.xlu1 %139 }
  0xd5   :  { %v165_v40 = vmul.f32 %v1081_v1, %v140_v39  ;;  %829 = vmatprep.mubr.f32.mxu0 %v299_v37  ;;  %v284_v41 = vadd.f32 %v1095_v9, %v264_v35 }
  0xd7   :  { %v265_v42 = vadd.f32 %v249_v38, %v165_v40  ;;  %v229_v43 = vpop.permute.xlu0 %228  ;;  %v300_v44 = vmax.f32 %v284_v41, 0.0  ;;  %v713_v41 = vld [vmem:[%s1158_s1 + $0x4] ss:$0 sm:$0xff] }
  0xd8   :  { %v250_v45 = vmul.f32 %v1086_v2, %v229_v43  ;;  %v145_v46 = vpop.permute.xlu1 %144  ;;  %v712_v2 = vld [vmem:[%s1158_s1 + $0x3] ss:$0 sm:$0xff]  ;;  %s714_s1 = sshll.u32 %s1042_s12, 6 }
  0xd9   :  { %v166_v47 = vmul.f32 %v1081_v1, %v145_v46  ;;  %830 = vmatmul.mubr.f32.gmra.mrb[12].mxu0 %v300_v44  ;;  %v285_v48 = vadd.f32 %v1095_v9, %v265_v42  ;;  %s688_s18 = scalar_lea.hbm %s1160_s3, %s714_s1 }
  0xdb   :  { %v266_v49 = vadd.f32 %v250_v45, %v166_v47  ;;  %v301_v50 = vmax.f32 %v285_v48, 0.0 }
  0xdd   :  { %832 = vmatprep.mubr.f32.mxu0 %v301_v50  ;;  %v286_v51 = vadd.f32 %v1095_v9, %v266_v49 }
  0xdf   :  { %v302_v52 = vmax.f32 %v286_v51, 0.0 }
  0xe1   :  { %833 = vmatmul.mubr.f32.gmra.mrb[14].mxu0 %v302_v52 }
 0x17c   :  { %v813_v1 = vpop.f32.mrb[0].mxu0 }
 0x17d   :  { %v395_v56 = vadd.f32 %v813_v1, %v712_v2  ;;  %v389_v57 = vpop.f32.mrb[1].mxu0 }
 0x17e   :  { %v390_v58 = vadd.f32 %v712_v2, %v389_v57 }
 0x17f   :  { %v469_v60 = vmax.f32 %v395_v56, 0.0 }
 0x180   :  { %v468_v59 = vmax.f32 %v390_v58, 0.0 }
 0x182   :  { %867 = vmatprep.mubr.f32.mxu1 %v468_v59 }
 0x183   :  { %868 = vmatmul.mubr.f32.vlgmr.msra.gmra.mrb[0].mxu1 %v469_v60 }
 0x184   :  { %v816_v9 = vpop.f32.mrb[2].mxu0 }
 0x185   :  { %v405_v61 = vadd.f32 %v816_v9, %v712_v2  ;;  %v399_v62 = vpop.f32.mrb[3].mxu0 }
 0x186   :  { %v400_v63 = vadd.f32 %v712_v2, %v399_v62 }
 0x187   :  { %v471_v3 = vmax.f32 %v405_v61, 0.0 }
 0x188   :  { %v470_v0 = vmax.f32 %v400_v63, 0.0 }
 0x18a   :  { %870 = vmatprep.mubr.f32.mxu1 %v470_v0 }
 0x18b   :  { %871 = vmatmul.mubr.f32.gmra.mrb[2].mxu1 %v471_v3 }
 0x18c   :  { %v819_v4 = vpop.f32.mrb[4].mxu0 }
 0x18d   :  { %v415_v5 = vadd.f32 %v819_v4, %v712_v2  ;;  %v409_v6 = vpop.f32.mrb[5].mxu0 }
 0x18e   :  { %v410_v7 = vadd.f32 %v712_v2, %v409_v6 }
 0x18f   :  { %v473_v10 = vmax.f32 %v415_v5, 0.0 }
 0x190   :  { %v472_v8 = vmax.f32 %v410_v7, 0.0 }
 0x192   :  { %873 = vmatprep.mubr.f32.mxu1 %v472_v8 }
 0x193   :  { %874 = vmatmul.mubr.f32.gmra.mrb[4].mxu1 %v473_v10 }
 0x194   :  { %v822_v11 = vpop.f32.mrb[6].mxu0 }
 0x195   :  { %v425_v12 = vadd.f32 %v822_v11, %v712_v2  ;;  %v419_v13 = vpop.f32.mrb[7].mxu0 }
 0x196   :  { %v420_v14 = vadd.f32 %v712_v2, %v419_v13 }
 0x197   :  { %v475_v16 = vmax.f32 %v425_v12, 0.0 }
 0x198   :  { %v474_v15 = vmax.f32 %v420_v14, 0.0 }
 0x19a   :  { %876 = vmatprep.mubr.f32.mxu1 %v474_v15 }
 0x19b   :  { %877 = vmatmul.mubr.f32.gmra.mrb[6].mxu1 %v475_v16 }
 0x19c   :  { %v825_v17 = vpop.f32.mrb[8].mxu0 }
 0x19d   :  { %v435_v18 = vadd.f32 %v825_v17, %v712_v2  ;;  %v429_v19 = vpop.f32.mrb[9].mxu0 }
 0x19e   :  { %v430_v20 = vadd.f32 %v712_v2, %v429_v19 }
 0x19f   :  { %v477_v22 = vmax.f32 %v435_v18, 0.0 }
 0x1a0   :  { %v476_v21 = vmax.f32 %v430_v20, 0.0 }
 0x1a2   :  { %879 = vmatprep.mubr.f32.mxu1 %v476_v21 }
 0x1a3   :  { %880 = vmatmul.mubr.f32.gmra.mrb[8].mxu1 %v477_v22 }
 0x1a4   :  { %v828_v23 = vpop.f32.mrb[10].mxu0 }
 0x1a5   :  { %v445_v24 = vadd.f32 %v828_v23, %v712_v2  ;;  %v439_v25 = vpop.f32.mrb[11].mxu0 }
 0x1a6   :  { %v440_v26 = vadd.f32 %v712_v2, %v439_v25 }
 0x1a7   :  { %v479_v28 = vmax.f32 %v445_v24, 0.0 }
 0x1a8   :  { %v478_v27 = vmax.f32 %v440_v26, 0.0 }
 0x1aa   :  { %882 = vmatprep.mubr.f32.mxu1 %v478_v27 }
 0x1ab   :  { %883 = vmatmul.mubr.f32.gmra.mrb[10].mxu1 %v479_v28 }
 0x1ac   :  { %v831_v29 = vpop.f32.mrb[12].mxu0 }
 0x1ad   :  { %v455_v30 = vadd.f32 %v831_v29, %v712_v2  ;;  %v449_v31 = vpop.f32.mrb[13].mxu0 }
 0x1ae   :  { %v450_v32 = vadd.f32 %v712_v2, %v449_v31 }
 0x1af   :  { %v481_v34 = vmax.f32 %v455_v30, 0.0 }
 0x1b0   :  { %v480_v33 = vmax.f32 %v450_v32, 0.0 }
 0x1b2   :  { %885 = vmatprep.mubr.f32.mxu1 %v480_v33 }
 0x1b3   :  { %886 = vmatmul.mubr.f32.gmra.mrb[12].mxu1 %v481_v34 }
 0x1b4   :  { %v834_v35 = vpop.f32.mrb[14].mxu0 }
 0x1b5   :  { %v465_v36 = vadd.f32 %v834_v35, %v712_v2  ;;  %v459_v37 = vpop.f32.mrb[15].mxu0 }
 0x1b6   :  { %v460_v38 = vadd.f32 %v712_v2, %v459_v37 }
 0x1b7   :  { %v483_v40 = vmax.f32 %v465_v36, 0.0 }
 0x1b8   :  { %v482_v39 = vmax.f32 %v460_v38, 0.0 }
 0x1ba   :  { %888 = vmatprep.mubr.f32.mxu1 %v482_v39 }
 0x1bb   :  { %889 = vmatmul.mubr.f32.gmra.mrb[14].mxu1 %v483_v40 }
 0x256   :  { %v869_v42 = vpop.f32.mrb[0].mxu1 }
 0x257   :  { %v570_v43 = vpop.f32.mrb[1].mxu1  ;;  %v576_v45 = vadd.f32 %v869_v42, %v713_v41 }
 0x258   :  { %v571_v44 = vadd.f32 %v713_v41, %v570_v43 }
 0x25a   :  { %649 = vxpose.xlu1.b32.start [1/16] (narrow) %v571_v44, 8 }
 0x25e   :  { %650 = vxpose.xlu1.b32.cont [2/16] (narrow) %v576_v45, 8  ;;  %v872_v46 = vpop.f32.mrb[2].mxu1 }
 0x25f   :  { %v580_v47 = vpop.f32.mrb[3].mxu1  ;;  %v586_v49 = vadd.f32 %v872_v46, %v713_v41 }
 0x260   :  { %v581_v48 = vadd.f32 %v713_v41, %v580_v47 }
 0x262   :  { %651 = vxpose.xlu1.b32.cont [3/16] (narrow) %v581_v48, 8 }
 0x266   :  { %652 = vxpose.xlu1.b32.cont [4/16] (narrow) %v586_v49, 8  ;;  %v875_v50 = vpop.f32.mrb[4].mxu1 }
 0x267   :  { %v590_v51 = vpop.f32.mrb[5].mxu1  ;;  %v596_v53 = vadd.f32 %v875_v50, %v713_v41 }
 0x268   :  { %v591_v52 = vadd.f32 %v713_v41, %v590_v51 }
 0x26a   :  { %653 = vxpose.xlu1.b32.cont [5/16] (narrow) %v591_v52, 8 }
 0x26e   :  { %654 = vxpose.xlu1.b32.cont [6/16] (narrow) %v596_v53, 8  ;;  %v878_v54 = vpop.f32.mrb[6].mxu1 }
 0x26f   :  { %v600_v55 = vpop.f32.mrb[7].mxu1  ;;  %v606_v1 = vadd.f32 %v878_v54, %v713_v41 }
 0x270   :  { %v601_v2 = vadd.f32 %v713_v41, %v600_v55 }
 0x272   :  { %655 = vxpose.xlu1.b32.cont [7/16] (narrow) %v601_v2, 8 }
 0x276   :  { %656 = vxpose.xlu1.b32.cont [8/16] (narrow) %v606_v1, 8  ;;  %v881_v56 = vpop.f32.mrb[8].mxu1 }
 0x277   :  { %v610_v57 = vpop.f32.mrb[9].mxu1  ;;  %v616_v59 = vadd.f32 %v881_v56, %v713_v41 }
 0x278   :  { %v611_v58 = vadd.f32 %v713_v41, %v610_v57 }
 0x27a   :  { %657 = vxpose.xlu1.b32.cont [9/16] (narrow) %v611_v58, 8 }
 0x27e   :  { %658 = vxpose.xlu1.b32.cont [10/16] (narrow) %v616_v59, 8  ;;  %v884_v60 = vpop.f32.mrb[10].mxu1 }
 0x27f   :  { %v620_v9 = vpop.f32.mrb[11].mxu1  ;;  %v626_v62 = vadd.f32 %v884_v60, %v713_v41 }
 0x280   :  { %v621_v61 = vadd.f32 %v713_v41, %v620_v9 }
 0x282   :  { %659 = vxpose.xlu1.b32.cont [11/16] (narrow) %v621_v61, 8 }
 0x286   :  { %660 = vxpose.xlu1.b32.cont [12/16] (narrow) %v626_v62, 8  ;;  %v887_v63 = vpop.f32.mrb[12].mxu1 }
 0x287   :  { %v630_v0 = vpop.f32.mrb[13].mxu1  ;;  %v636_v4 = vadd.f32 %v887_v63, %v713_v41 }
 0x288   :  { %v631_v3 = vadd.f32 %v713_v41, %v630_v0 }
 0x28a   :  { %661 = vxpose.xlu1.b32.cont [13/16] (narrow) %v631_v3, 8 }
 0x28e   :  { %662 = vxpose.xlu1.b32.cont [14/16] (narrow) %v636_v4, 8  ;;  %v890_v5 = vpop.f32.mrb[14].mxu1 }
 0x28f   :  { %v640_v6 = vpop.f32.mrb[15].mxu1  ;;  %v646_v8 = vadd.f32 %v890_v5, %v713_v41 }
 0x290   :  { %v641_v7 = vadd.f32 %v713_v41, %v640_v6 }
 0x292   :  { %663 = vxpose.xlu1.b32.cont [15/16] (narrow) %v641_v7, 8 }
 0x296   :  { %664 = vxpose.xlu1.b32.end [16/16] (narrow) %v646_v8, 8 }
 0x2da   :  { %v665_v10 = vpop.trf.xlu1 }
 0x2db   :  { %681 = vst [vmem:[#allocation5] sm:$0xf] %v665_v10 }
 0x2dc   :  { %999 = shalt.err (!%p996_p13)
}
 0x2dd   :  { %s1000_s20 = scalar_lea.hbm %s688_s18, 64  ;;  %s1002_s22 = scalar_lea.hbm %s1160_s3, 64 }
 0x2de   :  { %p1001_p0 = scmp.ne.s32.totalorder %s688_s18, %s1000_s20  ;;  %p1003_p1 = scmp.lt.u32.totalorder %s688_s18, %s1160_s3 }
 0x2df   :  { %p1004_p2 = scmp.lt.u32.totalorder %s1002_s22, %s1000_s20  ;;  %p1006_p4 = scmp.lt.u32.totalorder %s1000_s20, %s688_s18 }
 0x2e1   :  { %p1005_p3 = por %p1004_p2, %p1003_p1 }
 0x2e3   :  { %p1007_p5 = por %p1006_p4, %p1005_p3 }
 0x2e5   :  { %p1008_p6 = pnand %p1007_p5, %p1001_p0 }
 0x2e7   :  { %1011 = shalt.err (!%p1008_p6)
}
 0x2e8   :  { %693 = dma.vmem_to_hbm [thread:$0]  %s691_s15, 64, %s688_s18, [#allocation4]  }
 0x2e9   :  { %1014 = dma.done.wait [#allocation4], 64  }
 0x2ea   :  { %1015 = vsyncadd [#allocation4], 4294967232 }
 0x2eb   :  { %697 = vsyncpa [#allocation3], 1 }
 0x2ec   :  { %698 = vsyncpa [#allocation4], 1 }

// kernel: tpu_custom_call.1
= control target key start
LH: loop header
LB: loop body
LE: loop exit
PB: predicated region body
PF: predicated region fallthrough
CT: control target
= control target key end

     0   :  { %8 = vsyncpa [#allocation3], 0  ;;  %s1151_s0 = inlined_call_operand.vmem [shape: f32[128,2], index: 0, kind: input, shape index: {}]   ;;  %s1152_s1 = inlined_call_operand.vmem [shape: f32[8,128], index: 1, kind: input, shape index: {}]   ;;  %s1153_s2 = inlined_call_operand.hbm [shape: f32[256,128], index: 2, kind: input, shape index: {}]   ;;  %s1154_s3 = inlined_call_operand.hbm [shape: f32[4,128], index: 3, kind: output, shape index: {}]  }
   0x1   :  { %9 = vsyncpa [#allocation4], 0  ;;  %s984_s12 = smov [#allocation2]   ;;  %s936_s16 = scalar_lea.hbm %s1153_s2, 4096 }
   0x2   :  { %s19_s13 = sshll.u32 %s984_s12, 4  ;;  %p937_p0 = scmp.ne.s32.totalorder %s1153_s2, %s936_s16  ;;  %s20_s13 = int_to_ptr.vmem [resolvable:$true] %s19_s13 }
   0x3   :  { %p940_p1 = scmp.lt.u32.totalorder %s936_s16, %s1153_s2 }
   0x5   :  { %p942_p2 = pnand %p940_p1, %p937_p0 }
   0x7   :  { %945 = shalt.err (!%p942_p2)
}
   0x8   :  { %s946_s21 = scalar_lea.vmem %s20_s13, 4096  ;;  %p951_p4 = scmp.lt.s32.totalorder %s20_s13, %s20_s13 }
   0x9   :  { %p947_p3 = scmp.ne.s32.totalorder %s20_s13, %s946_s21  ;;  %p952_p5 = scmp.lt.s32.totalorder %s946_s21, %s946_s21 }
   0xb   :  { %p953_p6 = por %p952_p5, %p951_p4 }
   0xd   :  { %p954_p7 = pnand %p953_p6, %p947_p3 }
   0xf   :  { %957 = shalt.err (!%p954_p7)
}
  0x10   :  { %s985_s22 = smov 128   ;;  %s986_s23 = smov 8  }
  0x11   :  { %25 = dma.hbm_to_vmem [thread:$0]  %s1153_s2, 4096, %s20_s13, [#allocation3], %s985_s22, %s985_s22, %s986_s23  }
  0x12   :  { %980 = dma.done.wait [#allocation3], 4096  }
  0x13   :  { %981 = vsyncadd [#allocation3], 4294963200  ;;  %v987_v0 = vmov 0   ;;  %v30_v1 = vld [vmem:[%s1151_s0 + $0x8] sm:$0xff]  ;;  %v29_v2 = vld [vmem:[%s1151_s0] sm:$0xff]  ;;  %v988_v3 = vmov 1  }
  0x14   :  { %933 = vset.pattern.permute.xlu1 %v987_v0  ;;  %931 = vset.pattern.permute.xlu0 %v987_v0  ;;  %v286_v4 = vld [vmem:[#allocation2] sm:$0xff]  ;;  %v287_v5 = vld [vmem:[#allocation2 + $0x8] sm:$0xff]  ;;  %v288_v7 = vld [vmem:[#allocation2 + $0x10] sm:$0xff] }
  0x15   :  { %57 = vperm.xlu1 %933, %v30_v1   ;;  %52 = vperm.xlu0 %931, %v29_v2   ;;  %v861_v6 = vpack.c.bf16 %v287_v5, %v286_v4  ;;  %v289_v8 = vld [vmem:[#allocation2 + $0x18] sm:$0xff]  ;;  %v31_v9 = vld [vmem:[%s1151_s0 + $0x10] sm:$0xff]  ;;  %v290_v11 = vld [vmem:[#allocation2 + $0x20] sm:$0xff] }
  0x16   :  { %v865_v10 = vpack.c.bf16 %v289_v8, %v288_v7  ;;  %v291_v12 = vld [vmem:[#allocation2 + $0x28] sm:$0xff]  ;;  %v32_v14 = vld [vmem:[%s1151_s0 + $0x18] sm:$0xff]  ;;  %v293_v16 = vld [vmem:[#allocation2 + $0x38] sm:$0xff] }
  0x17   :  { %862 = vmatprep.subr.bf16.mxu0 %v861_v6  ;;  %v869_v13 = vpack.c.bf16 %v291_v12, %v290_v11  ;;  %v292_v15 = vld [vmem:[#allocation2 + $0x30] sm:$0xff]  ;;  %v33_v18 = vld [vmem:[%s1151_s0 + $0x20] sm:$0xff]  ;;  %v294_v19 = vld [vmem:[#allocation2 + $0x40] sm:$0xff] }
  0x18   :  { %864 = vmatpush3.bf16.msra.mxu0 %v861_v6  ;;  %v873_v17 = vpack.c.bf16 %v293_v16, %v292_v15  ;;  %v295_v20 = vld [vmem:[#allocation2 + $0x48] sm:$0xff]  ;;  %v34_v22 = vld [vmem:[%s1151_s0 + $0x28] sm:$0xff]  ;;  %v296_v23 = vld [vmem:[#allocation2 + $0x50] sm:$0xff] }
  0x19   :  { %934 = vset.pattern.permute.xlu1 %v988_v3  ;;  %932 = vset.pattern.permute.xlu0 %v988_v3  ;;  %v877_v21 = vpack.c.bf16 %v295_v20, %v294_v19  ;;  %v297_v24 = vld [vmem:[#allocation2 + $0x58] sm:$0xff]  ;;  %v35_v26 = vld [vmem:[%s1151_s0 + $0x30] sm:$0xff]  ;;  %v298_v27 = vld [vmem:[#allocation2 + $0x60] sm:$0xff] }
  0x1a   :  { %155 = vperm.xlu1 %934, %v30_v1   ;;  %151 = vperm.xlu0 %932, %v29_v2   ;;  %v881_v25 = vpack.c.bf16 %v297_v24, %v296_v23  ;;  %v299_v28 = vld [vmem:[#allocation2 + $0x68] sm:$0xff]  ;;  %v36_v30 = vld [vmem:[%s1151_s0 + $0x38] sm:$0xff]  ;;  %v301_v32 = vld [vmem:[#allocation2 + $0x78] sm:$0xff] }
  0x1b   :  { %866 = vmatprep.subr.bf16.mxu0 %v865_v10  ;;  %v885_v29 = vpack.c.bf16 %v299_v28, %v298_v27  ;;  %v300_v31 = vld [vmem:[#allocation2 + $0x70] sm:$0xff]  ;;  %v37_v34 = vld [vmem:[%s1151_s0 + $0x40] sm:$0xff]  ;;  %v38_v35 = vld [vmem:[%s1151_s0 + $0x48] sm:$0xff] }
  0x1c   :  { %868 = vmatpush3.bf16.msra.mxu0 %v865_v10  ;;  %v889_v33 = vpack.c.bf16 %v301_v32, %v300_v31  ;;  %v39_v36 = vld [vmem:[%s1151_s0 + $0x50] sm:$0xff]  ;;  %v40_v37 = vld [vmem:[%s1151_s0 + $0x58] sm:$0xff]  ;;  %v41_v38 = vld [vmem:[%s1151_s0 + $0x60] sm:$0xff] }
  0x1d   :  { %870 = vmatprep.subr.bf16.mxu0 %v869_v13  ;;  %v42_v39 = vld [vmem:[%s1151_s0 + $0x68] sm:$0xff]  ;;  %v43_v40 = vld [vmem:[%s1151_s0 + $0x70] sm:$0xff]  ;;  %v44_v41 = vld [vmem:[%s1151_s0 + $0x78] sm:$0xff] }
  0x1e   :  { %935 = vset.pattern.permute.xlu1 %v987_v0  ;;  %159 = vperm.xlu0 %932, %v31_v9   ;;  %v467_v42 = vld [vmem:[#allocation2 + $0x80] sm:$0xff]  ;;  %v468_v43 = vld [vmem:[#allocation2 + $0x88] sm:$0xff]  ;;  %v469_v44 = vld [vmem:[#allocation2 + $0x90] sm:$0xff] }
  0x1f   :  { %62 = vperm.xlu1 %935, %v31_v9   ;;  %v893_v45 = vpack.c.bf16 %v468_v43, %v467_v42  ;;  %v470_v46 = vld [vmem:[#allocation2 + $0x98] sm:$0xff]  ;;  %v471_v48 = vld [vmem:[#allocation2 + $0xa0] sm:$0xff]  ;;  %v472_v49 = vld [vmem:[#allocation2 + $0xa8] sm:$0xff] }
  0x20   :  { %872 = vmatpush3.bf16.msra.mxu0 %v869_v13  ;;  %v897_v47 = vpack.c.bf16 %v470_v46, %v469_v44  ;;  %v901_v50 = vpack.c.bf16 %v472_v49, %v471_v48  ;;  %v473_v51 = vld [vmem:[#allocation2 + $0xb0] sm:$0xff]  ;;  %v474_v52 = vld [vmem:[#allocation2 + $0xb8] sm:$0xff]  ;;  %v475_v54 = vld [vmem:[#allocation2 + $0xc0] sm:$0xff] }
  0x21   :  { %874 = vmatprep.subr.bf16.mxu0 %v873_v17  ;;  %894 = vmatprep.subr.bf16.mxu1 %v893_v45  ;;  %v905_v53 = vpack.c.bf16 %v474_v52, %v473_v51  ;;  %v476_v55 = vld [vmem:[#allocation2 + $0xc8] sm:$0xff]  ;;  %v477_v57 = vld [vmem:[#allocation2 + $0xd0] sm:$0xff]  ;;  %v478_v58 = vld [vmem:[#allocation2 + $0xd8] sm:$0xff] }
  0x22   :  { %163 = vperm.xlu0 %932, %v32_v14   ;;  %896 = vmatpush3.bf16.msra.mxu1 %v893_v45  ;;  %v909_v56 = vpack.c.bf16 %v476_v55, %v475_v54  ;;  %v913_v59 = vpack.c.bf16 %v478_v58, %v477_v57  ;;  %v479_v60 = vld [vmem:[#allocation2 + $0xe0] sm:$0xff]  ;;  %v480_v61 = vld [vmem:[#allocation2 + $0xe8] sm:$0xff]  ;;  %v1073_v1 = vld [vmem:[%s1152_s1] ss:$0 sm:$0xff] }
  0x23   :  { %67 = vperm.xlu1 %935, %v32_v14   ;;  %898 = vmatprep.subr.bf16.mxu1 %v897_v47  ;;  %v917_v62 = vpack.c.bf16 %v480_v61, %v479_v60  ;;  %v1078_v2 = vld [vmem:[%s1152_s1 + $0x1] ss:$0 sm:$0xff]  ;;  %v1087_v9 = vld [vmem:[%s1152_s1 + $0x2] ss:$0 sm:$0xff] }
  0x24   :  { %876 = vmatpush3.bf16.msra.mxu0 %v873_v17 }
  0x25   :  { %878 = vmatprep.subr.bf16.mxu0 %v877_v21 }
  0x26   :  { %167 = vperm.xlu0 %932, %v33_v18   ;;  %900 = vmatpush3.bf16.msra.mxu1 %v897_v47 }
  0x27   :  { %72 = vperm.xlu1 %935, %v33_v18   ;;  %902 = vmatprep.subr.bf16.mxu1 %v901_v50 }
  0x28   :  { %880 = vmatpush3.bf16.msra.mxu0 %v877_v21 }
  0x29   :  { %882 = vmatprep.subr.bf16.mxu0 %v881_v25 }
  0x2a   :  { %171 = vperm.xlu0 %932, %v34_v22   ;;  %904 = vmatpush3.bf16.msra.mxu1 %v901_v50 }
  0x2b   :  { %77 = vperm.xlu1 %935, %v34_v22   ;;  %906 = vmatprep.subr.bf16.mxu1 %v905_v53 }
  0x2c   :  { %884 = vmatpush3.bf16.msra.mxu0 %v881_v25 }
  0x2d   :  { %886 = vmatprep.subr.bf16.mxu0 %v885_v29 }
  0x2e   :  { %175 = vperm.xlu0 %932, %v35_v26   ;;  %908 = vmatpush3.bf16.msra.mxu1 %v905_v53 }
  0x2f   :  { %82 = vperm.xlu1 %935, %v35_v26   ;;  %910 = vmatprep.subr.bf16.mxu1 %v909_v56 }
  0x30   :  { %888 = vmatpush3.bf16.msra.mxu0 %v885_v29 }
  0x31   :  { %890 = vmatprep.subr.bf16.mxu0 %v889_v33 }
  0x32   :  { %179 = vperm.xlu0 %932, %v36_v30   ;;  %912 = vmatpush3.bf16.msra.mxu1 %v909_v56 }
  0x33   :  { %87 = vperm.xlu1 %935, %v36_v30   ;;  %914 = vmatprep.subr.bf16.mxu1 %v913_v59 }
  0x34   :  { %892 = vmatpush3.bf16.msra.mxu0 %v889_v33 }
  0x36   :  { %183 = vperm.xlu0 %932, %v37_v34   ;;  %916 = vmatpush3.bf16.msra.mxu1 %v913_v59 }
  0x37   :  { %92 = vperm.xlu1 %935, %v37_v34   ;;  %918 = vmatprep.subr.bf16.mxu1 %v917_v62 }
  0x3a   :  { %187 = vperm.xlu0 %932, %v38_v35   ;;  %920 = vmatpush3.bf16.msra.mxu1 %v917_v62 }
  0x3b   :  { %97 = vperm.xlu1 %935, %v38_v35  }
  0x3e   :  { %191 = vperm.xlu0 %932, %v39_v36  }
  0x3f   :  { %102 = vperm.xlu1 %935, %v39_v36  }
  0x42   :  { %195 = vperm.xlu0 %932, %v40_v37  }
  0x43   :  { %107 = vperm.xlu1 %935, %v40_v37  }
  0x46   :  { %199 = vperm.xlu0 %932, %v41_v38  }
  0x47   :  { %112 = vperm.xlu1 %935, %v41_v38  }
  0x4a   :  { %203 = vperm.xlu0 %932, %v42_v39  }
  0x4b   :  { %117 = vperm.xlu1 %935, %v42_v39  }
  0x4e   :  { %207 = vperm.xlu0 %932, %v43_v40  }
  0x4f   :  { %122 = vperm.xlu1 %935, %v43_v40  }
  0x52   :  { %211 = vperm.xlu0 %932, %v44_v41  }
  0x53   :  { %127 = vperm.xlu1 %935, %v44_v41  }
  0x94   :  { %v58_v63 = vpop.permute.xlu1 %57  ;;  %v53_v0 = vpop.permute.xlu0 %52 }
  0x95   :  { %v135_v5 = vmul.f32 %v1073_v1, %v58_v63  ;;  %v134_v6 = vmul.f32 %v1073_v1, %v53_v0 }
  0x99   :  { %v156_v3 = vpop.permute.xlu1 %155  ;;  %v152_v4 = vpop.permute.xlu0 %151 }
  0x9a   :  { %v219_v7 = vmul.f32 %v1078_v2, %v156_v3  ;;  %v218_v8 = vmul.f32 %v1078_v2, %v152_v4 }
  0x9c   :  { %v235_v10 = vadd.f32 %v219_v7, %v135_v5  ;;  %v234_v11 = vadd.f32 %v218_v8, %v134_v6 }
  0x9d   :  { %v160_v12 = vpop.permute.xlu0 %159 }
  0x9e   :  { %v220_v13 = vmul.f32 %v1078_v2, %v160_v12  ;;  %v63_v14 = vpop.permute.xlu1 %62  ;;  %v254_v15 = vadd.f32 %v1087_v9, %v234_v11  ;;  %v255_v16 = vadd.f32 %v1087_v9, %v235_v10 }
  0x9f   :  { %v136_v17 = vmul.f32 %v1073_v1, %v63_v14 }
  0xa0   :  { %v270_v18 = vmax.f32 %v254_v15, 0.0  ;;  %v271_v19 = vmax.f32 %v255_v16, 0.0 }
  0xa1   :  { %v236_v20 = vadd.f32 %v220_v13, %v136_v17  ;;  %v164_v21 = vpop.permute.xlu0 %163 }
  0xa2   :  { %v221_v22 = vmul.f32 %v1078_v2, %v164_v21  ;;  %v68_v23 = vpop.permute.xlu1 %67  ;;  %781 = vmatprep.mubr.f32.mxu0 %v270_v18 }
  0xa3   :  { %v137_v24 = vmul.f32 %v1073_v1, %v68_v23  ;;  %782 = vmatmul.mubr.f32.vlgmr.msra.gmra.mrb[0].mxu0 %v271_v19  ;;  %v256_v25 = vadd.f32 %v1087_v9, %v236_v20 }
  0xa5   :  { %v237_v26 = vadd.f32 %v221_v22, %v137_v24  ;;  %v168_v27 = vpop.permute.xlu0 %167  ;;  %v272_v28 = vmax.f32 %v256_v25, 0.0 }
  0xa6   :  { %v222_v29 = vmul.f32 %v1078_v2, %v168_v27  ;;  %v73_v30 = vpop.permute.xlu1 %72 }
  0xa7   :  { %v138_v31 = vmul.f32 %v1073_v1, %v73_v30  ;;  %784 = vmatprep.mubr.f32.mxu0 %v272_v28  ;;  %v257_v32 = vadd.f32 %v1087_v9, %v237_v26 }
  0xa9   :  { %v238_v33 = vadd.f32 %v222_v29, %v138_v31  ;;  %v172_v34 = vpop.permute.xlu0 %171  ;;  %v273_v35 = vmax.f32 %v257_v32, 0.0 }
  0xaa   :  { %v223_v36 = vmul.f32 %v1078_v2, %v172_v34  ;;  %v78_v37 = vpop.permute.xlu1 %77 }
  0xab   :  { %v139_v38 = vmul.f32 %v1073_v1, %v78_v37  ;;  %785 = vmatmul.mubr.f32.gmra.mrb[2].mxu0 %v273_v35  ;;  %v258_v39 = vadd.f32 %v1087_v9, %v238_v33 }
  0xad   :  { %v239_v40 = vadd.f32 %v223_v36, %v139_v38  ;;  %v176_v41 = vpop.permute.xlu0 %175  ;;  %v274_v42 = vmax.f32 %v258_v39, 0.0 }
  0xae   :  { %v224_v43 = vmul.f32 %v1078_v2, %v176_v41  ;;  %v83_v44 = vpop.permute.xlu1 %82 }
  0xaf   :  { %v140_v45 = vmul.f32 %v1073_v1, %v83_v44  ;;  %787 = vmatprep.mubr.f32.mxu0 %v274_v42  ;;  %v259_v46 = vadd.f32 %v1087_v9, %v239_v40 }
  0xb1   :  { %v240_v47 = vadd.f32 %v224_v43, %v140_v45  ;;  %v180_v48 = vpop.permute.xlu0 %179  ;;  %v275_v49 = vmax.f32 %v259_v46, 0.0 }
  0xb2   :  { %v225_v50 = vmul.f32 %v1078_v2, %v180_v48  ;;  %v88_v51 = vpop.permute.xlu1 %87 }
  0xb3   :  { %v141_v52 = vmul.f32 %v1073_v1, %v88_v51  ;;  %788 = vmatmul.mubr.f32.gmra.mrb[4].mxu0 %v275_v49  ;;  %v260_v53 = vadd.f32 %v1087_v9, %v240_v47 }
  0xb5   :  { %v241_v54 = vadd.f32 %v225_v50, %v141_v52  ;;  %v184_v55 = vpop.permute.xlu0 %183  ;;  %v276_v56 = vmax.f32 %v260_v53, 0.0  ;;  %v481_v53 = vld [vmem:[#allocation2 + $0xf0] sm:$0xff] }
  0xb6   :  { %v226_v57 = vmul.f32 %v1078_v2, %v184_v55  ;;  %v93_v58 = vpop.permute.xlu1 %92 }
  0xb7   :  { %v142_v59 = vmul.f32 %v1073_v1, %v93_v58  ;;  %790 = vmatprep.mubr.f32.mxu0 %v276_v56  ;;  %v261_v60 = vadd.f32 %v1087_v9, %v241_v54  ;;  %v482_v54 = vld [vmem:[#allocation2 + $0xf8] sm:$0xff] }
  0xb8   :  { %v921_v55 = vpack.c.bf16 %v482_v54, %v481_v53 }
  0xb9   :  { %v242_v61 = vadd.f32 %v226_v57, %v142_v59  ;;  %v188_v62 = vpop.permute.xlu0 %187  ;;  %v277_v63 = vmax.f32 %v261_v60, 0.0 }
  0xba   :  { %v227_v0 = vmul.f32 %v1078_v2, %v188_v62  ;;  %v98_v3 = vpop.permute.xlu1 %97  ;;  %922 = vmatprep.subr.bf16.mxu1 %v921_v55 }
  0xbb   :  { %v143_v4 = vmul.f32 %v1073_v1, %v98_v3  ;;  %791 = vmatmul.mubr.f32.gmra.mrb[6].mxu0 %v277_v63  ;;  %v262_v5 = vadd.f32 %v1087_v9, %v242_v61  ;;  %924 = vmatpush3.bf16.msra.mxu1 %v921_v55 }
  0xbd   :  { %v243_v6 = vadd.f32 %v227_v0, %v143_v4  ;;  %v192_v7 = vpop.permute.xlu0 %191  ;;  %v278_v8 = vmax.f32 %v262_v5, 0.0 }
  0xbe   :  { %v228_v10 = vmul.f32 %v1078_v2, %v192_v7  ;;  %v103_v11 = vpop.permute.xlu1 %102 }
  0xbf   :  { %v144_v12 = vmul.f32 %v1073_v1, %v103_v11  ;;  %793 = vmatprep.mubr.f32.mxu0 %v278_v8  ;;  %v263_v13 = vadd.f32 %v1087_v9, %v243_v6 }
  0xc1   :  { %v244_v14 = vadd.f32 %v228_v10, %v144_v12  ;;  %v196_v15 = vpop.permute.xlu0 %195  ;;  %v279_v16 = vmax.f32 %v263_v13, 0.0 }
  0xc2   :  { %v229_v17 = vmul.f32 %v1078_v2, %v196_v15  ;;  %v108_v18 = vpop.permute.xlu1 %107 }
  0xc3   :  { %v145_v19 = vmul.f32 %v1073_v1, %v108_v18  ;;  %794 = vmatmul.mubr.f32.gmra.mrb[8].mxu0 %v279_v16  ;;  %v264_v20 = vadd.f32 %v1087_v9, %v244_v14 }
  0xc5   :  { %v245_v21 = vadd.f32 %v229_v17, %v145_v19  ;;  %v200_v22 = vpop.permute.xlu0 %199  ;;  %v280_v23 = vmax.f32 %v264_v20, 0.0 }
  0xc6   :  { %v230_v24 = vmul.f32 %v1078_v2, %v200_v22  ;;  %v113_v25 = vpop.permute.xlu1 %112 }
  0xc7   :  { %v146_v26 = vmul.f32 %v1073_v1, %v113_v25  ;;  %796 = vmatprep.mubr.f32.mxu0 %v280_v23  ;;  %v265_v27 = vadd.f32 %v1087_v9, %v245_v21 }
  0xc9   :  { %v246_v28 = vadd.f32 %v230_v24, %v146_v26  ;;  %v204_v29 = vpop.permute.xlu0 %203  ;;  %v281_v30 = vmax.f32 %v265_v27, 0.0 }
  0xca   :  { %v231_v31 = vmul.f32 %v1078_v2, %v204_v29  ;;  %v118_v32 = vpop.permute.xlu1 %117 }
  0xcb   :  { %v147_v33 = vmul.f32 %v1073_v1, %v118_v32  ;;  %797 = vmatmul.mubr.f32.gmra.mrb[10].mxu0 %v281_v30  ;;  %v266_v34 = vadd.f32 %v1087_v9, %v246_v28 }
  0xcd   :  { %v247_v35 = vadd.f32 %v231_v31, %v147_v33  ;;  %v208_v36 = vpop.permute.xlu0 %207  ;;  %v282_v37 = vmax.f32 %v266_v34, 0.0 }
  0xce   :  { %v232_v38 = vmul.f32 %v1078_v2, %v208_v36  ;;  %v123_v39 = vpop.permute.xlu1 %122 }
  0xcf   :  { %v148_v40 = vmul.f32 %v1073_v1, %v123_v39  ;;  %799 = vmatprep.mubr.f32.mxu0 %v282_v37  ;;  %v267_v41 = vadd.f32 %v1087_v9, %v247_v35 }
  0xd1   :  { %v248_v42 = vadd.f32 %v232_v38, %v148_v40  ;;  %v212_v43 = vpop.permute.xlu0 %211  ;;  %v283_v44 = vmax.f32 %v267_v41, 0.0  ;;  %v684_v41 = vld [vmem:[%s1152_s1 + $0x4] ss:$0 sm:$0xff] }
  0xd2   :  { %v233_v45 = vmul.f32 %v1078_v2, %v212_v43  ;;  %v128_v46 = vpop.permute.xlu1 %127  ;;  %v683_v2 = vld [vmem:[%s1152_s1 + $0x3] ss:$0 sm:$0xff]  ;;  %s989_s1 = smov [#allocation5]  }
  0xd3   :  { %v149_v47 = vmul.f32 %v1073_v1, %v128_v46  ;;  %800 = vmatmul.mubr.f32.gmra.mrb[12].mxu0 %v283_v44  ;;  %v268_v48 = vadd.f32 %v1087_v9, %v248_v42  ;;  %s671_s11 = sshll.u32 %s989_s1, 4  ;;  %s672_s11 = int_to_ptr.vmem [resolvable:$true] %s671_s11 }
  0xd4   :  { %s958_s12 = scalar_lea.vmem %s672_s11, 64  ;;  %p963_p9 = scmp.lt.s32.totalorder %s672_s11, %s672_s11 }
  0xd5   :  { %v249_v49 = vadd.f32 %v233_v45, %v149_v47  ;;  %v284_v50 = vmax.f32 %v268_v48, 0.0  ;;  %p959_p8 = scmp.ne.s32.totalorder %s672_s11, %s958_s12  ;;  %p964_p10 = scmp.lt.s32.totalorder %s958_s12, %s958_s12 }
  0xd7   :  { %802 = vmatprep.mubr.f32.mxu0 %v284_v50  ;;  %v269_v51 = vadd.f32 %v1087_v9, %v249_v49  ;;  %p965_p11 = por %p964_p10, %p963_p9 }
  0xd9   :  { %v285_v52 = vmax.f32 %v269_v51, 0.0  ;;  %p966_p12 = pnand %p965_p11, %p959_p8 }
  0xdb   :  { %803 = vmatmul.mubr.f32.gmra.mrb[14].mxu0 %v285_v52 }
 0x176   :  { %v783_v1 = vpop.f32.mrb[0].mxu0 }
 0x177   :  { %v378_v56 = vadd.f32 %v783_v1, %v683_v2  ;;  %v372_v57 = vpop.f32.mrb[1].mxu0 }
 0x178   :  { %v373_v58 = vadd.f32 %v683_v2, %v372_v57 }
 0x179   :  { %v452_v60 = vmax.f32 %v378_v56, 0.0 }
 0x17a   :  { %v451_v59 = vmax.f32 %v373_v58, 0.0 }
 0x17c   :  { %837 = vmatprep.mubr.f32.mxu1 %v451_v59 }
 0x17d   :  { %838 = vmatmul.mubr.f32.vlgmr.msra.gmra.mrb[0].mxu1 %v452_v60 }
 0x17e   :  { %v786_v9 = vpop.f32.mrb[2].mxu0 }
 0x17f   :  { %v388_v61 = vadd.f32 %v786_v9, %v683_v2  ;;  %v382_v62 = vpop.f32.mrb[3].mxu0 }
 0x180   :  { %v383_v63 = vadd.f32 %v683_v2, %v382_v62 }
 0x181   :  { %v454_v3 = vmax.f32 %v388_v61, 0.0 }
 0x182   :  { %v453_v0 = vmax.f32 %v383_v63, 0.0 }
 0x184   :  { %840 = vmatprep.mubr.f32.mxu1 %v453_v0 }
 0x185   :  { %841 = vmatmul.mubr.f32.gmra.mrb[2].mxu1 %v454_v3 }
 0x186   :  { %v789_v4 = vpop.f32.mrb[4].mxu0 }
 0x187   :  { %v398_v5 = vadd.f32 %v789_v4, %v683_v2  ;;  %v392_v6 = vpop.f32.mrb[5].mxu0 }
 0x188   :  { %v393_v7 = vadd.f32 %v683_v2, %v392_v6 }
 0x189   :  { %v456_v10 = vmax.f32 %v398_v5, 0.0 }
 0x18a   :  { %v455_v8 = vmax.f32 %v393_v7, 0.0 }
 0x18c   :  { %843 = vmatprep.mubr.f32.mxu1 %v455_v8 }
 0x18d   :  { %844 = vmatmul.mubr.f32.gmra.mrb[4].mxu1 %v456_v10 }
 0x18e   :  { %v792_v11 = vpop.f32.mrb[6].mxu0 }
 0x18f   :  { %v408_v12 = vadd.f32 %v792_v11, %v683_v2  ;;  %v402_v13 = vpop.f32.mrb[7].mxu0 }
 0x190   :  { %v403_v14 = vadd.f32 %v683_v2, %v402_v13 }
 0x191   :  { %v458_v16 = vmax.f32 %v408_v12, 0.0 }
 0x192   :  { %v457_v15 = vmax.f32 %v403_v14, 0.0 }
 0x194   :  { %846 = vmatprep.mubr.f32.mxu1 %v457_v15 }
 0x195   :  { %847 = vmatmul.mubr.f32.gmra.mrb[6].mxu1 %v458_v16 }
 0x196   :  { %v795_v17 = vpop.f32.mrb[8].mxu0 }
 0x197   :  { %v418_v18 = vadd.f32 %v795_v17, %v683_v2  ;;  %v412_v19 = vpop.f32.mrb[9].mxu0 }
 0x198   :  { %v413_v20 = vadd.f32 %v683_v2, %v412_v19 }
 0x199   :  { %v460_v22 = vmax.f32 %v418_v18, 0.0 }
 0x19a   :  { %v459_v21 = vmax.f32 %v413_v20, 0.0 }
 0x19c   :  { %849 = vmatprep.mubr.f32.mxu1 %v459_v21 }
 0x19d   :  { %850 = vmatmul.mubr.f32.gmra.mrb[8].mxu1 %v460_v22 }
 0x19e   :  { %v798_v23 = vpop.f32.mrb[10].mxu0 }
 0x19f   :  { %v428_v24 = vadd.f32 %v798_v23, %v683_v2  ;;  %v422_v25 = vpop.f32.mrb[11].mxu0 }
 0x1a0   :  { %v423_v26 = vadd.f32 %v683_v2, %v422_v25 }
 0x1a1   :  { %v462_v28 = vmax.f32 %v428_v24, 0.0 }
 0x1a2   :  { %v461_v27 = vmax.f32 %v423_v26, 0.0 }
 0x1a4   :  { %852 = vmatprep.mubr.f32.mxu1 %v461_v27 }
 0x1a5   :  { %853 = vmatmul.mubr.f32.gmra.mrb[10].mxu1 %v462_v28 }
 0x1a6   :  { %v801_v29 = vpop.f32.mrb[12].mxu0 }
 0x1a7   :  { %v438_v30 = vadd.f32 %v801_v29, %v683_v2  ;;  %v432_v31 = vpop.f32.mrb[13].mxu0 }
 0x1a8   :  { %v433_v32 = vadd.f32 %v683_v2, %v432_v31 }
 0x1a9   :  { %v464_v34 = vmax.f32 %v438_v30, 0.0 }
 0x1aa   :  { %v463_v33 = vmax.f32 %v433_v32, 0.0 }
 0x1ac   :  { %855 = vmatprep.mubr.f32.mxu1 %v463_v33 }
 0x1ad   :  { %856 = vmatmul.mubr.f32.gmra.mrb[12].mxu1 %v464_v34 }
 0x1ae   :  { %v804_v35 = vpop.f32.mrb[14].mxu0 }
 0x1af   :  { %v448_v36 = vadd.f32 %v804_v35, %v683_v2  ;;  %v442_v37 = vpop.f32.mrb[15].mxu0 }
 0x1b0   :  { %v443_v38 = vadd.f32 %v683_v2, %v442_v37 }
 0x1b1   :  { %v466_v40 = vmax.f32 %v448_v36, 0.0 }
 0x1b2   :  { %v465_v39 = vmax.f32 %v443_v38, 0.0 }
 0x1b4   :  { %858 = vmatprep.mubr.f32.mxu1 %v465_v39 }
 0x1b5   :  { %859 = vmatmul.mubr.f32.gmra.mrb[14].mxu1 %v466_v40 }
 0x250   :  { %v839_v42 = vpop.f32.mrb[0].mxu1 }
 0x251   :  { %v553_v43 = vpop.f32.mrb[1].mxu1  ;;  %v559_v45 = vadd.f32 %v839_v42, %v684_v41 }
 0x252   :  { %v554_v44 = vadd.f32 %v684_v41, %v553_v43 }
 0x254   :  { %632 = vxpose.xlu1.b32.start [1/16] (narrow) %v554_v44, 8 }
 0x258   :  { %633 = vxpose.xlu1.b32.cont [2/16] (narrow) %v559_v45, 8  ;;  %v842_v46 = vpop.f32.mrb[2].mxu1 }
 0x259   :  { %v563_v47 = vpop.f32.mrb[3].mxu1  ;;  %v569_v49 = vadd.f32 %v842_v46, %v684_v41 }
 0x25a   :  { %v564_v48 = vadd.f32 %v684_v41, %v563_v47 }
 0x25c   :  { %634 = vxpose.xlu1.b32.cont [3/16] (narrow) %v564_v48, 8 }
 0x260   :  { %635 = vxpose.xlu1.b32.cont [4/16] (narrow) %v569_v49, 8  ;;  %v845_v50 = vpop.f32.mrb[4].mxu1 }
 0x261   :  { %v573_v51 = vpop.f32.mrb[5].mxu1  ;;  %v579_v53 = vadd.f32 %v845_v50, %v684_v41 }
 0x262   :  { %v574_v52 = vadd.f32 %v684_v41, %v573_v51 }
 0x264   :  { %636 = vxpose.xlu1.b32.cont [5/16] (narrow) %v574_v52, 8 }
 0x268   :  { %637 = vxpose.xlu1.b32.cont [6/16] (narrow) %v579_v53, 8  ;;  %v848_v54 = vpop.f32.mrb[6].mxu1 }
 0x269   :  { %v583_v55 = vpop.f32.mrb[7].mxu1  ;;  %v589_v1 = vadd.f32 %v848_v54, %v684_v41 }
 0x26a   :  { %v584_v2 = vadd.f32 %v684_v41, %v583_v55 }
 0x26c   :  { %638 = vxpose.xlu1.b32.cont [7/16] (narrow) %v584_v2, 8 }
 0x270   :  { %639 = vxpose.xlu1.b32.cont [8/16] (narrow) %v589_v1, 8  ;;  %v851_v56 = vpop.f32.mrb[8].mxu1 }
 0x271   :  { %v593_v57 = vpop.f32.mrb[9].mxu1  ;;  %v599_v59 = vadd.f32 %v851_v56, %v684_v41 }
 0x272   :  { %v594_v58 = vadd.f32 %v684_v41, %v593_v57 }
 0x274   :  { %640 = vxpose.xlu1.b32.cont [9/16] (narrow) %v594_v58, 8 }
 0x278   :  { %641 = vxpose.xlu1.b32.cont [10/16] (narrow) %v599_v59, 8  ;;  %v854_v60 = vpop.f32.mrb[10].mxu1 }
 0x279   :  { %v603_v9 = vpop.f32.mrb[11].mxu1  ;;  %v609_v62 = vadd.f32 %v854_v60, %v684_v41 }
 0x27a   :  { %v604_v61 = vadd.f32 %v684_v41, %v603_v9 }
 0x27c   :  { %642 = vxpose.xlu1.b32.cont [11/16] (narrow) %v604_v61, 8 }
 0x280   :  { %643 = vxpose.xlu1.b32.cont [12/16] (narrow) %v609_v62, 8  ;;  %v857_v63 = vpop.f32.mrb[12].mxu1 }
 0x281   :  { %v613_v0 = vpop.f32.mrb[13].mxu1  ;;  %v619_v4 = vadd.f32 %v857_v63, %v684_v41 }
 0x282   :  { %v614_v3 = vadd.f32 %v684_v41, %v613_v0 }
 0x284   :  { %644 = vxpose.xlu1.b32.cont [13/16] (narrow) %v614_v3, 8 }
 0x288   :  { %645 = vxpose.xlu1.b32.cont [14/16] (narrow) %v619_v4, 8  ;;  %v860_v5 = vpop.f32.mrb[14].mxu1 }
 0x289   :  { %v623_v6 = vpop.f32.mrb[15].mxu1  ;;  %v629_v8 = vadd.f32 %v860_v5, %v684_v41 }
 0x28a   :  { %v624_v7 = vadd.f32 %v684_v41, %v623_v6 }
 0x28c   :  { %646 = vxpose.xlu1.b32.cont [15/16] (narrow) %v624_v7, 8 }
 0x290   :  { %647 = vxpose.xlu1.b32.end [16/16] (narrow) %v629_v8, 8 }
 0x2d4   :  { %v648_v10 = vpop.trf.xlu1 }
 0x2d5   :  { %664 = vst [vmem:[#allocation5] sm:$0xf] %v648_v10 }
 0x2d6   :  { %969 = shalt.err (!%p966_p12)
}
 0x2d7   :  { %s970_s15 = scalar_lea.hbm %s1154_s3, 64 }
 0x2d8   :  { %p971_p13 = scmp.ne.s32.totalorder %s1154_s3, %s970_s15  ;;  %p974_p0 = scmp.lt.u32.totalorder %s970_s15, %s1154_s3 }
 0x2da   :  { %p976_p1 = pnand %p974_p0, %p971_p13 }
 0x2dc   :  { %979 = shalt.err (!%p976_p1)
}
 0x2dd   :  { %674 = dma.vmem_to_hbm [thread:$0]  %s672_s11, 64, %s1154_s3, [#allocation4]  }
 0x2de   :  { %982 = dma.done.wait [#allocation4], 64  }
 0x2df   :  { %983 = vsyncadd [#allocation4], 4294967232 }
 0x2e0   :  { %678 = vsyncpa [#allocation3], 1 }
 0x2e1   :  { %679 = vsyncpa [#allocation4], 1 }

</bundles_post_ra>
